<compile_context>
chip_gen: v7x
topology: tpu7x:2x2x1
jax: 0.10.0
libtpu: 0.0.40
codegen_flags: <defaults>
</compile_context>

<pallas_src>
import functools

import jax
import jax.numpy as jnp
from jax.experimental import pallas as pl
from jax.experimental.pallas import tpu as pltpu


# ------------------------------ Pallas kernel ------------------------------ #

def _affine_coupling_kernel(x_ref, mask_ref, w1_ref, b1_ref, w2_ref, b2_ref,
                            w3_ref, b3_ref, out_ref, *, H, W, C):
    """Fused AffineCoupling forward for one image (channel-major layout).

    x_ref   : (1, C, HW)      input dtype   full image (in_a rows then in_b rows)
    mask_ref: (9, HW)         f32           per-tap 3x3 boundary-validity masks
    w1_ref  : (F, 9*half)     bf16          conv1 weight (taps stacked on cols)
    w2_ref  : (F, F)          bf16          conv2 (1x1) weight
    w3_ref  : (9*C, F)        bf16          conv3 weight (taps stacked on rows)
    b*_ref  : column-vector   f32           biases
    out_ref : (1, C, HW)      input dtype   rows [:half]=in_a, rows [half:]=out_b
    """
    HW = H * W
    half = C // 2
    cdt = w1_ref.dtype                       # bf16 MXU operand dtype

    x = x_ref[0]                             # (C, HW), original dtype
    in_a = x[:half, :].astype(jnp.float32)
    in_b = x[half:, :].astype(jnp.float32)
    mask = mask_ref[...]                     # (9, HW) f32 {0,1}

    def tap_align(slab, tap):
        """Shift tap `tap` of a (rows, HW) slab onto its output pixel and
        zero the out-of-image contributions (mask precomputed host-side)."""
        dy = tap // 3 - 1
        dx = tap % 3 - 1
        off = dy * W + dx
        if off % HW != 0:
            slab = pltpu.roll(slab, (-off) % HW, axis=1)   # XLU lane rotate
        return slab * mask[tap:tap + 1, :]

    # net[0]: Conv2d(half, F, 3, padding=1) + ReLU.  im2col operand built in
    # VMEM from the resident in_a slab (never materialized in HBM).
    x1 = jnp.concatenate([tap_align(in_a, t) for t in range(9)], axis=0)
    h1 = jnp.dot(w1_ref[...], x1.astype(cdt),
                 preferred_element_type=jnp.float32) + b1_ref[...]
    h1 = jnp.maximum(h1, 0.0)                                  # (F, HW)

    # net[2]: Conv2d(F, F, 1) + ReLU  (h1 never leaves VMEM/vregs)
    h2 = jnp.dot(w2_ref[...], h1.astype(cdt),
                 preferred_element_type=jnp.float32) + b2_ref[...]
    h2 = jnp.maximum(h2, 0.0)                                  # (F, HW)

    # net[4]: ZeroConv2d(F, C), 3x3, padding=1 — one stacked matmul produces
    # all 9 taps; each (C, HW) slab is rolled to its output pixel + masked.
    big = jnp.dot(w3_ref[...], h2.astype(cdt),
                  preferred_element_type=jnp.float32)          # (9*C, HW)
    net = jnp.zeros((C, HW), jnp.float32)
    for t in range(9):                                          # unrolled
        net = net + tap_align(big[t * C:(t + 1) * C, :], t)
    net = net + b3_ref[...]

    # Coupling: log_s, t = net.chunk(2); out_b = (in_b + t) * sigmoid(log_s+2)
    log_s = net[:half, :]
    t_shift = net[half:, :]
    s = pl.reciprocal(1.0 + jnp.exp(-(log_s + 2.0)), approx=True)   # EUP path
    out_b = (in_b + t_shift) * s

    out_ref[0, :half, :] = x[:half, :].astype(out_ref.dtype)   # in_a passthrough
    out_ref[0, half:, :] = out_b.astype(out_ref.dtype)


# ----------------------- One-time parameter preparation --------------------- #

def prepare_params(params, H, W):
    """Cache kernel-ready constants ONCE (bf16 transposed weights, column
    biases, 3x3 boundary masks) — not redone per forward call."""
    F, half = params["w1"].shape[:2]
    C = params["w3"].shape[0]
    cdt = jnp.bfloat16

    w1T = params["w1"].transpose(0, 2, 3, 1).reshape(F, 9 * half).astype(cdt)
    w2T = params["w2"][:, :, 0, 0].astype(cdt)                         # (F, F)
    w3s = params["w3"].transpose(2, 3, 0, 1).reshape(9 * C, F).astype(cdt)
    b1c = params["b1"].reshape(F, 1).astype(jnp.float32)
    b2c = params["b2"].reshape(F, 1).astype(jnp.float32)
    b3c = params["b3"].reshape(C, 1).astype(jnp.float32)

    # Per-tap validity mask: mask[ky*3+kx, y*W+x] = 1 iff (y+ky-1, x+kx-1)
    # lies inside the image.  Pure function of (H, W) — computed once.
    yy = jnp.repeat(jnp.arange(H), W)
    xx = jnp.tile(jnp.arange(W), H)
    rows = []
    for ky in range(3):
        for kx in range(3):
            dy, dx = ky - 1, kx - 1
            v = ((yy + dy >= 0) & (yy + dy < H) &
                 (xx + dx >= 0) & (xx + dx < W))
            rows.append(v.astype(jnp.float32))
    mask = jnp.stack(rows, axis=0)                                     # (9, HW)

    return dict(w1=w1T, b1=b1c, w2=w2T, b2=b2c, w3=w3s, b3=b3c, mask=mask)


# -------------------------------- Wrapper ----------------------------------- #

def affine_coupling_forward(x_nchw, prep):
    """AffineCoupling.forward — NCHW in, NCHW out (same dtype as input)."""
    B, C, H, W = x_nchw.shape
    half = C // 2
    HW = H * W
    F = prep["w1"].shape[0]

    xT = x_nchw.reshape(B, C, HW)          # pure reshape — no HBM reshuffle

    kernel = functools.partial(_affine_coupling_kernel, H=H, W=W, C=C)

    weight_bytes = sum(int(prep[k].size) * prep[k].dtype.itemsize
                       for k in ("w1", "b1", "w2", "b2", "w3", "b3", "mask"))
    flops = 2 * B * HW * (F * 9 * half + F * F + 9 * C * F)
    transcendentals = 2 * B * half * HW
    bytes_accessed = int(2 * xT.size * xT.dtype.itemsize + weight_bytes)

    # VMEM budget: double-buffered I/O + weights + resident f32 intermediates
    # (x1, h1, h2, big, net + temporaries), clamped to 48 MiB for v7x.
    itm = x_nchw.dtype.itemsize
    io_bytes = 2 * 2 * C * HW * itm
    interm_bytes = 4 * HW * (9 * half + 2 * F + 9 * C + 4 * C) * 2
    vmem_limit = int(min(max(io_bytes + 2 * weight_bytes + interm_bytes
                             + (2 << 20), 16 << 20), 48 << 20))

    out = pl.pallas_call(
        kernel,
        out_shape=jax.ShapeDtypeStruct((B, C, HW), x_nchw.dtype),
        grid=(B,),
        in_specs=[
            pl.BlockSpec((1, C, HW), lambda b: (b, 0, 0)),       # x (a & b halves)
            pl.BlockSpec((9, HW), lambda b: (0, 0)),             # boundary masks
            pl.BlockSpec((F, 9 * half), lambda b: (0, 0)),       # w1
            pl.BlockSpec((F, 1), lambda b: (0, 0)),              # b1
            pl.BlockSpec((F, F), lambda b: (0, 0)),              # w2
            pl.BlockSpec((F, 1), lambda b: (0, 0)),              # b2
            pl.BlockSpec((9 * C, F), lambda b: (0, 0)),          # w3 (stacked taps)
            pl.BlockSpec((C, 1), lambda b: (0, 0)),              # b3
        ],
        out_specs=pl.BlockSpec((1, C, HW), lambda b: (b, 0, 0)),
        compiler_params=pltpu.CompilerParams(
            dimension_semantics=("parallel",),
            vmem_limit_bytes=vmem_limit),
        cost_estimate=pl.CostEstimate(
            flops=flops, transcendentals=transcendentals,
            bytes_accessed=bytes_accessed),
    )(xT, prep["mask"], prep["w1"], prep["b1"], prep["w2"], prep["b2"],
      prep["w3"], prep["b3"])

    return out.reshape(B, C, H, W)


# ------------------------ Params & pure-JAX reference ----------------------- #

def init_params(key, in_channel, filter_size):
    half = in_channel // 2
    k1, k2, k3, k4 = jax.random.split(key, 4)
    # net[0]: Conv2d(half, filter, 3, pad=1): weight ~ N(0, 0.05), bias = 0
    w1 = 0.05 * jax.random.normal(k1, (filter_size, half, 3, 3), jnp.float32)
    b1 = jnp.zeros((filter_size,), jnp.float32)
    # net[2]: Conv2d(filter, filter, 1): weight ~ N(0, 0.05), bias = 0
    w2 = 0.05 * jax.random.normal(k2, (filter_size, filter_size, 1, 1), jnp.float32)
    b2 = jnp.zeros((filter_size,), jnp.float32)
    # net[4]: ZeroConv2d(filter, in_channel) -> Conv2d(filter, in_channel, 3)
    # (synthetic small-normal init; not a checkpoint)
    w3 = 0.1 * jax.random.normal(k3, (in_channel, filter_size, 3, 3), jnp.float32)
    b3 = 0.1 * jax.random.normal(k4, (in_channel,), jnp.float32)
    return dict(w1=w1, b1=b1, w2=w2, b2=b2, w3=w3, b3=b3)


def reference_forward(x_nchw, params):
    """Pure-JAX reference (same bf16 operands / f32 accumulation)."""
    half = x_nchw.shape[1] // 2
    in_a, in_b = x_nchw[:, :half], x_nchw[:, half:]
    cdt = jnp.bfloat16
    dn = ("NCHW", "OIHW", "NCHW")

    def conv(u, w, pad):
        return jax.lax.conv_general_dilated(
            u.astype(cdt), w.astype(cdt), (1, 1), pad,
            dimension_numbers=dn, preferred_element_type=jnp.float32)

    h1 = jax.nn.relu(conv(in_a, params["w1"], ((1, 1), (1, 1)))
                     + params["b1"][None, :, None, None])
    h2 = jax.nn.relu(conv(h1, params["w2"], ((0, 0), (0, 0)))
                     + params["b2"][None, :, None, None])
    net = (conv(h2, params["w3"], ((1, 1), (1, 1)))
           + params["b3"][None, :, None, None])
    log_s, t = net[:, :half], net[:, half:]
    s = jax.nn.sigmoid(log_s + 2.0)
    out_b = (in_b + t) * s
    return jnp.concatenate([in_a, out_b], axis=1)


# ---------------------------------- Main ------------------------------------ #

if __name__ == "__main__":
    key = jax.random.PRNGKey(0)
    k_x, k_p = jax.random.split(key)

    B, C, H, W = 2, 4, 16, 16        # in_channel=4, small spatial
    FILTER_SIZE = 128                # reduced hidden size for the demo

    x = jax.random.normal(k_x, (B, C, H, W), dtype=jnp.float32)
    params = init_params(k_p, in_channel=C, filter_size=FILTER_SIZE)

    # One-time weight/mask prep (cached across forward calls).
    prep = prepare_params(params, H, W)

    fwd = jax.jit(affine_coupling_forward)
    out = jax.block_until_ready(fwd(x, prep))
    assert out.shape == (B, C, H, W) and out.dtype == x.dtype

    ref = jax.block_until_ready(jax.jit(reference_forward)(x, params))
    max_err = float(jnp.max(jnp.abs(out - ref)))
    assert max_err < 2e-2, f"mismatch vs reference: max abs err = {max_err}"

    print("KERNEL_OK")
</pallas_src>

<mosaic_0001>
module attributes {stable_mosaic.version = 11 : i64} {
  func.func @_affine_coupling_kernel(%arg0: i32, %arg1: memref<1x4x256xf32, #tpu.memory_space<vmem>>, %arg2: memref<9x256xf32, #tpu.memory_space<vmem>>, %arg3: memref<128x18xbf16, #tpu.memory_space<vmem>>, %arg4: memref<128x1xf32, #tpu.memory_space<vmem>>, %arg5: memref<128x128xbf16, #tpu.memory_space<vmem>>, %arg6: memref<128x1xf32, #tpu.memory_space<vmem>>, %arg7: memref<36x128xbf16, #tpu.memory_space<vmem>>, %arg8: memref<4x1xf32, #tpu.memory_space<vmem>>, %arg9: memref<1x4x256xf32, #tpu.memory_space<vmem>>) attributes {dimension_semantics = [#tpu.dimension_semantics<parallel>], iteration_bounds = array<i64: 2>, scalar_prefetch = 0 : i64, scratch_operands = 0 : i64, tpu.core_type = #tpu.core_type<tc>, window_params = [{transform_indices = @transform_0, window_bounds = array<i64: 1, 4, 256>}, {pipeline_mode = #tpu.pipeline_mode<synchronous>, transform_indices = @transform_1, window_bounds = array<i64: 9, 256>}, {pipeline_mode = #tpu.pipeline_mode<synchronous>, transform_indices = @transform_2, window_bounds = array<i64: 128, 18>}, {pipeline_mode = #tpu.pipeline_mode<synchronous>, transform_indices = @transform_3, window_bounds = array<i64: 128, 1>}, {pipeline_mode = #tpu.pipeline_mode<synchronous>, transform_indices = @transform_4, window_bounds = array<i64: 128, 128>}, {pipeline_mode = #tpu.pipeline_mode<synchronous>, transform_indices = @transform_5, window_bounds = array<i64: 128, 1>}, {pipeline_mode = #tpu.pipeline_mode<synchronous>, transform_indices = @transform_6, window_bounds = array<i64: 36, 128>}, {pipeline_mode = #tpu.pipeline_mode<synchronous>, transform_indices = @transform_7, window_bounds = array<i64: 4, 1>}, {transform_indices = @transform_8, window_bounds = array<i64: 1, 4, 256>}]} {
    %c0 = arith.constant 0 : index
    %c0_0 = arith.constant 0 : index
    %c0_1 = arith.constant 0 : index
    %0 = vector.load %arg1[%c0, %c0_0, %c0_1] : memref<1x4x256xf32, #tpu.memory_space<vmem>>, vector<1x4x256xf32>
    %1 = vector.shape_cast %0 : vector<1x4x256xf32> to vector<4x256xf32>
    %2 = vector.extract_strided_slice %1 {offsets = [0, 0], sizes = [2, 256], strides = [1, 1]} : vector<4x256xf32> to vector<2x256xf32>
    %3 = vector.extract_strided_slice %1 {offsets = [2, 0], sizes = [2, 256], strides = [1, 1]} : vector<4x256xf32> to vector<2x256xf32>
    %c0_2 = arith.constant 0 : index
    %c0_3 = arith.constant 0 : index
    %4 = vector.load %arg2[%c0_2, %c0_3] : memref<9x256xf32, #tpu.memory_space<vmem>>, vector<9x256xf32>
    %c17_i32 = arith.constant 17 : i32
    %5 = tpu.dynamic_rotate %2 by %c17_i32 dim 1 : vector<2x256xf32>, i32 -> vector<2x256xf32>
    %6 = vector.extract_strided_slice %4 {offsets = [0, 0], sizes = [1, 256], strides = [1, 1]} : vector<9x256xf32> to vector<1x256xf32>
    %7 = vector.broadcast %6 : vector<1x256xf32> to vector<2x256xf32>
    %8 = arith.mulf %5, %7 : vector<2x256xf32>
    %c16_i32 = arith.constant 16 : i32
    %9 = tpu.dynamic_rotate %2 by %c16_i32 dim 1 : vector<2x256xf32>, i32 -> vector<2x256xf32>
    %10 = vector.extract_strided_slice %4 {offsets = [1, 0], sizes = [1, 256], strides = [1, 1]} : vector<9x256xf32> to vector<1x256xf32>
    %11 = vector.broadcast %10 : vector<1x256xf32> to vector<2x256xf32>
    %12 = arith.mulf %9, %11 : vector<2x256xf32>
    %c15_i32 = arith.constant 15 : i32
    %13 = tpu.dynamic_rotate %2 by %c15_i32 dim 1 : vector<2x256xf32>, i32 -> vector<2x256xf32>
    %14 = vector.extract_strided_slice %4 {offsets = [2, 0], sizes = [1, 256], strides = [1, 1]} : vector<9x256xf32> to vector<1x256xf32>
    %15 = vector.broadcast %14 : vector<1x256xf32> to vector<2x256xf32>
    %16 = arith.mulf %13, %15 : vector<2x256xf32>
    %c1_i32 = arith.constant 1 : i32
    %17 = tpu.dynamic_rotate %2 by %c1_i32 dim 1 : vector<2x256xf32>, i32 -> vector<2x256xf32>
    %18 = vector.extract_strided_slice %4 {offsets = [3, 0], sizes = [1, 256], strides = [1, 1]} : vector<9x256xf32> to vector<1x256xf32>
    %19 = vector.broadcast %18 : vector<1x256xf32> to vector<2x256xf32>
    %20 = arith.mulf %17, %19 : vector<2x256xf32>
    %21 = vector.extract_strided_slice %4 {offsets = [4, 0], sizes = [1, 256], strides = [1, 1]} : vector<9x256xf32> to vector<1x256xf32>
    %22 = vector.broadcast %21 : vector<1x256xf32> to vector<2x256xf32>
    %23 = arith.mulf %2, %22 : vector<2x256xf32>
    %c255_i32 = arith.constant 255 : i32
    %24 = tpu.dynamic_rotate %2 by %c255_i32 dim 1 : vector<2x256xf32>, i32 -> vector<2x256xf32>
    %25 = vector.extract_strided_slice %4 {offsets = [5, 0], sizes = [1, 256], strides = [1, 1]} : vector<9x256xf32> to vector<1x256xf32>
    %26 = vector.broadcast %25 : vector<1x256xf32> to vector<2x256xf32>
    %27 = arith.mulf %24, %26 : vector<2x256xf32>
    %c241_i32 = arith.constant 241 : i32
    %28 = tpu.dynamic_rotate %2 by %c241_i32 dim 1 : vector<2x256xf32>, i32 -> vector<2x256xf32>
    %29 = vector.extract_strided_slice %4 {offsets = [6, 0], sizes = [1, 256], strides = [1, 1]} : vector<9x256xf32> to vector<1x256xf32>
    %30 = vector.broadcast %29 : vector<1x256xf32> to vector<2x256xf32>
    %31 = arith.mulf %28, %30 : vector<2x256xf32>
    %c240_i32 = arith.constant 240 : i32
    %32 = tpu.dynamic_rotate %2 by %c240_i32 dim 1 : vector<2x256xf32>, i32 -> vector<2x256xf32>
    %33 = vector.extract_strided_slice %4 {offsets = [7, 0], sizes = [1, 256], strides = [1, 1]} : vector<9x256xf32> to vector<1x256xf32>
    %34 = vector.broadcast %33 : vector<1x256xf32> to vector<2x256xf32>
    %35 = arith.mulf %32, %34 : vector<2x256xf32>
    %c239_i32 = arith.constant 239 : i32
    %36 = tpu.dynamic_rotate %2 by %c239_i32 dim 1 : vector<2x256xf32>, i32 -> vector<2x256xf32>
    %37 = vector.extract_strided_slice %4 {offsets = [8, 0], sizes = [1, 256], strides = [1, 1]} : vector<9x256xf32> to vector<1x256xf32>
    %38 = vector.broadcast %37 : vector<1x256xf32> to vector<2x256xf32>
    %39 = arith.mulf %36, %38 : vector<2x256xf32>
    %40 = tpu.concatenate %8, %12, %16, %20, %23, %27, %31, %35, %39 in 0 : vector<2x256xf32>, vector<2x256xf32>, vector<2x256xf32>, vector<2x256xf32>, vector<2x256xf32>, vector<2x256xf32>, vector<2x256xf32>, vector<2x256xf32>, vector<2x256xf32> -> vector<18x256xf32>
    %c0_4 = arith.constant 0 : index
    %c0_5 = arith.constant 0 : index
    %41 = vector.load %arg3[%c0_4, %c0_5] : memref<128x18xbf16, #tpu.memory_space<vmem>>, vector<128x18xbf16>
    %42 = arith.truncf %40 : vector<18x256xf32> to vector<18x256xbf16>
    %cst = arith.constant dense<0.000000e+00> : vector<128x256xf32>
    %43 = tpu.matmul %41, %42, %cst {dimension_numbers = #tpu.dot_dimension_numbers<[1], [0], [0], [1], [0, 0, 1, 1], [], []>} : vector<128x18xbf16>, vector<18x256xbf16>, vector<128x256xf32> -> vector<128x256xf32>
    %c0_6 = arith.constant 0 : index
    %c0_7 = arith.constant 0 : index
    %44 = vector.load %arg4[%c0_6, %c0_7] : memref<128x1xf32, #tpu.memory_space<vmem>>, vector<128x1xf32>
    %45 = vector.broadcast %44 : vector<128x1xf32> to vector<128x256xf32>
    %46 = arith.addf %43, %45 : vector<128x256xf32>
    %cst_8 = arith.constant 0.000000e+00 : f32
    %47 = vector.broadcast %cst_8 : f32 to vector<128x256xf32>
    %48 = arith.maximumf %46, %47 : vector<128x256xf32>
    %c0_9 = arith.constant 0 : index
    %c0_10 = arith.constant 0 : index
    %49 = vector.load %arg5[%c0_9, %c0_10] : memref<128x128xbf16, #tpu.memory_space<vmem>>, vector<128x128xbf16>
    %50 = arith.truncf %48 : vector<128x256xf32> to vector<128x256xbf16>
    %cst_11 = arith.constant dense<0.000000e+00> : vector<128x256xf32>
    %51 = tpu.matmul %49, %50, %cst_11 {dimension_numbers = #tpu.dot_dimension_numbers<[1], [0], [0], [1], [0, 0, 1, 1], [], []>} : vector<128x128xbf16>, vector<128x256xbf16>, vector<128x256xf32> -> vector<128x256xf32>
    %c0_12 = arith.constant 0 : index
    %c0_13 = arith.constant 0 : index
    %52 = vector.load %arg6[%c0_12, %c0_13] : memref<128x1xf32, #tpu.memory_space<vmem>>, vector<128x1xf32>
    %53 = vector.broadcast %52 : vector<128x1xf32> to vector<128x256xf32>
    %54 = arith.addf %51, %53 : vector<128x256xf32>
    %cst_14 = arith.constant 0.000000e+00 : f32
    %55 = vector.broadcast %cst_14 : f32 to vector<128x256xf32>
    %56 = arith.maximumf %54, %55 : vector<128x256xf32>
    %c0_15 = arith.constant 0 : index
    %c0_16 = arith.constant 0 : index
    %57 = vector.load %arg7[%c0_15, %c0_16] : memref<36x128xbf16, #tpu.memory_space<vmem>>, vector<36x128xbf16>
    %58 = arith.truncf %56 : vector<128x256xf32> to vector<128x256xbf16>
    %cst_17 = arith.constant dense<0.000000e+00> : vector<36x256xf32>
    %59 = tpu.matmul %57, %58, %cst_17 {dimension_numbers = #tpu.dot_dimension_numbers<[1], [0], [0], [1], [0, 0, 1, 1], [], []>} : vector<36x128xbf16>, vector<128x256xbf16>, vector<36x256xf32> -> vector<36x256xf32>
    %cst_18 = arith.constant 0.000000e+00 : f32
    %60 = vector.broadcast %cst_18 : f32 to vector<4x256xf32>
    %61 = vector.extract_strided_slice %59 {offsets = [0, 0], sizes = [4, 256], strides = [1, 1]} : vector<36x256xf32> to vector<4x256xf32>
    %c17_i32_19 = arith.constant 17 : i32
    %62 = tpu.dynamic_rotate %61 by %c17_i32_19 dim 1 : vector<4x256xf32>, i32 -> vector<4x256xf32>
    %63 = vector.extract_strided_slice %4 {offsets = [0, 0], sizes = [1, 256], strides = [1, 1]} : vector<9x256xf32> to vector<1x256xf32>
    %64 = vector.broadcast %63 : vector<1x256xf32> to vector<4x256xf32>
    %65 = arith.mulf %62, %64 : vector<4x256xf32>
    %66 = arith.addf %60, %65 : vector<4x256xf32>
    %67 = vector.extract_strided_slice %59 {offsets = [4, 0], sizes = [4, 256], strides = [1, 1]} : vector<36x256xf32> to vector<4x256xf32>
    %c16_i32_20 = arith.constant 16 : i32
    %68 = tpu.dynamic_rotate %67 by %c16_i32_20 dim 1 : vector<4x256xf32>, i32 -> vector<4x256xf32>
    %69 = vector.extract_strided_slice %4 {offsets = [1, 0], sizes = [1, 256], strides = [1, 1]} : vector<9x256xf32> to vector<1x256xf32>
    %70 = vector.broadcast %69 : vector<1x256xf32> to vector<4x256xf32>
    %71 = arith.mulf %68, %70 : vector<4x256xf32>
    %72 = arith.addf %66, %71 : vector<4x256xf32>
    %73 = vector.extract_strided_slice %59 {offsets = [8, 0], sizes = [4, 256], strides = [1, 1]} : vector<36x256xf32> to vector<4x256xf32>
    %c15_i32_21 = arith.constant 15 : i32
    %74 = tpu.dynamic_rotate %73 by %c15_i32_21 dim 1 : vector<4x256xf32>, i32 -> vector<4x256xf32>
    %75 = vector.extract_strided_slice %4 {offsets = [2, 0], sizes = [1, 256], strides = [1, 1]} : vector<9x256xf32> to vector<1x256xf32>
    %76 = vector.broadcast %75 : vector<1x256xf32> to vector<4x256xf32>
    %77 = arith.mulf %74, %76 : vector<4x256xf32>
    %78 = arith.addf %72, %77 : vector<4x256xf32>
    %79 = vector.extract_strided_slice %59 {offsets = [12, 0], sizes = [4, 256], strides = [1, 1]} : vector<36x256xf32> to vector<4x256xf32>
    %c1_i32_22 = arith.constant 1 : i32
    %80 = tpu.dynamic_rotate %79 by %c1_i32_22 dim 1 : vector<4x256xf32>, i32 -> vector<4x256xf32>
    %81 = vector.extract_strided_slice %4 {offsets = [3, 0], sizes = [1, 256], strides = [1, 1]} : vector<9x256xf32> to vector<1x256xf32>
    %82 = vector.broadcast %81 : vector<1x256xf32> to vector<4x256xf32>
    %83 = arith.mulf %80, %82 : vector<4x256xf32>
    %84 = arith.addf %78, %83 : vector<4x256xf32>
    %85 = vector.extract_strided_slice %59 {offsets = [16, 0], sizes = [4, 256], strides = [1, 1]} : vector<36x256xf32> to vector<4x256xf32>
    %86 = vector.extract_strided_slice %4 {offsets = [4, 0], sizes = [1, 256], strides = [1, 1]} : vector<9x256xf32> to vector<1x256xf32>
    %87 = vector.broadcast %86 : vector<1x256xf32> to vector<4x256xf32>
    %88 = arith.mulf %85, %87 : vector<4x256xf32>
    %89 = arith.addf %84, %88 : vector<4x256xf32>
    %90 = vector.extract_strided_slice %59 {offsets = [20, 0], sizes = [4, 256], strides = [1, 1]} : vector<36x256xf32> to vector<4x256xf32>
    %c255_i32_23 = arith.constant 255 : i32
    %91 = tpu.dynamic_rotate %90 by %c255_i32_23 dim 1 : vector<4x256xf32>, i32 -> vector<4x256xf32>
    %92 = vector.extract_strided_slice %4 {offsets = [5, 0], sizes = [1, 256], strides = [1, 1]} : vector<9x256xf32> to vector<1x256xf32>
    %93 = vector.broadcast %92 : vector<1x256xf32> to vector<4x256xf32>
    %94 = arith.mulf %91, %93 : vector<4x256xf32>
    %95 = arith.addf %89, %94 : vector<4x256xf32>
    %96 = vector.extract_strided_slice %59 {offsets = [24, 0], sizes = [4, 256], strides = [1, 1]} : vector<36x256xf32> to vector<4x256xf32>
    %c241_i32_24 = arith.constant 241 : i32
    %97 = tpu.dynamic_rotate %96 by %c241_i32_24 dim 1 : vector<4x256xf32>, i32 -> vector<4x256xf32>
    %98 = vector.extract_strided_slice %4 {offsets = [6, 0], sizes = [1, 256], strides = [1, 1]} : vector<9x256xf32> to vector<1x256xf32>
    %99 = vector.broadcast %98 : vector<1x256xf32> to vector<4x256xf32>
    %100 = arith.mulf %97, %99 : vector<4x256xf32>
    %101 = arith.addf %95, %100 : vector<4x256xf32>
    %102 = vector.extract_strided_slice %59 {offsets = [28, 0], sizes = [4, 256], strides = [1, 1]} : vector<36x256xf32> to vector<4x256xf32>
    %c240_i32_25 = arith.constant 240 : i32
    %103 = tpu.dynamic_rotate %102 by %c240_i32_25 dim 1 : vector<4x256xf32>, i32 -> vector<4x256xf32>
    %104 = vector.extract_strided_slice %4 {offsets = [7, 0], sizes = [1, 256], strides = [1, 1]} : vector<9x256xf32> to vector<1x256xf32>
    %105 = vector.broadcast %104 : vector<1x256xf32> to vector<4x256xf32>
    %106 = arith.mulf %103, %105 : vector<4x256xf32>
    %107 = arith.addf %101, %106 : vector<4x256xf32>
    %108 = vector.extract_strided_slice %59 {offsets = [32, 0], sizes = [4, 256], strides = [1, 1]} : vector<36x256xf32> to vector<4x256xf32>
    %c239_i32_26 = arith.constant 239 : i32
    %109 = tpu.dynamic_rotate %108 by %c239_i32_26 dim 1 : vector<4x256xf32>, i32 -> vector<4x256xf32>
    %110 = vector.extract_strided_slice %4 {offsets = [8, 0], sizes = [1, 256], strides = [1, 1]} : vector<9x256xf32> to vector<1x256xf32>
    %111 = vector.broadcast %110 : vector<1x256xf32> to vector<4x256xf32>
    %112 = arith.mulf %109, %111 : vector<4x256xf32>
    %113 = arith.addf %107, %112 : vector<4x256xf32>
    %c0_27 = arith.constant 0 : index
    %c0_28 = arith.constant 0 : index
    %114 = vector.load %arg8[%c0_27, %c0_28] : memref<4x1xf32, #tpu.memory_space<vmem>>, vector<4x1xf32>
    %115 = vector.broadcast %114 : vector<4x1xf32> to vector<4x256xf32>
    %116 = arith.addf %113, %115 : vector<4x256xf32>
    %117 = vector.extract_strided_slice %116 {offsets = [0, 0], sizes = [2, 256], strides = [1, 1]} : vector<4x256xf32> to vector<2x256xf32>
    %118 = vector.extract_strided_slice %116 {offsets = [2, 0], sizes = [2, 256], strides = [1, 1]} : vector<4x256xf32> to vector<2x256xf32>
    %cst_29 = arith.constant 2.000000e+00 : f32
    %119 = vector.broadcast %cst_29 : f32 to vector<2x256xf32>
    %120 = arith.addf %117, %119 : vector<2x256xf32>
    %cst_30 = arith.constant 0.000000e+00 : f32
    %121 = vector.broadcast %cst_30 : f32 to vector<2x256xf32>
    %122 = arith.subf %121, %120 : vector<2x256xf32>
    %123 = math.exp %122 : vector<2x256xf32>
    %cst_31 = arith.constant 1.000000e+00 : f32
    %124 = vector.broadcast %cst_31 : f32 to vector<2x256xf32>
    %125 = arith.addf %124, %123 : vector<2x256xf32>
    %126 = tpu.reciprocal %125 {approx = true} : vector<2x256xf32> -> vector<2x256xf32>
    %127 = arith.addf %3, %118 : vector<2x256xf32>
    %128 = arith.mulf %127, %126 : vector<2x256xf32>
    %129 = vector.extract_strided_slice %1 {offsets = [0, 0], sizes = [2, 256], strides = [1, 1]} : vector<4x256xf32> to vector<2x256xf32>
    %c0_32 = arith.constant 0 : index
    %c0_33 = arith.constant 0 : index
    %c0_34 = arith.constant 0 : index
    %130 = vector.load %arg9[%c0_32, %c0_33, %c0_34] : memref<1x4x256xf32, #tpu.memory_space<vmem>>, vector<1x2x256xf32>
    %131 = vector.shape_cast %130 : vector<1x2x256xf32> to vector<2x256xf32>
    %132 = vector.shape_cast %129 : vector<2x256xf32> to vector<1x2x256xf32>
    tpu.vector_store %arg9[%c0_32, %c0_33, %c0_34], %132 {strides = array<i32>} : memref<1x4x256xf32, #tpu.memory_space<vmem>>, vector<1x2x256xf32>,
    %c0_35 = arith.constant 0 : index
    %c2 = arith.constant 2 : index
    %c0_36 = arith.constant 0 : index
    %133 = vector.load %arg9[%c0_35, %c2, %c0_36] : memref<1x4x256xf32, #tpu.memory_space<vmem>>, vector<1x2x256xf32>
    %134 = vector.shape_cast %133 : vector<1x2x256xf32> to vector<2x256xf32>
    %135 = vector.shape_cast %128 : vector<2x256xf32> to vector<1x2x256xf32>
    tpu.vector_store %arg9[%c0_35, %c2, %c0_36], %135 {strides = array<i32>} : memref<1x4x256xf32, #tpu.memory_space<vmem>>, vector<1x2x256xf32>,
    return
  }
  func.func @transform_0(%arg0: i32) -> (i32, i32, i32) {
    %c0_i32 = arith.constant 0 : i32
    %c0_i32_0 = arith.constant 0 : i32
    %c0_i32_1 = arith.constant 0 : i32
    return %arg0, %c0_i32, %c0_i32_0 : i32, i32, i32
  }
  func.func @transform_1(%arg0: i32) -> (i32, i32) {
    %c0_i32 = arith.constant 0 : i32
    %c0_i32_0 = arith.constant 0 : i32
    %c0_i32_1 = arith.constant 0 : i32
    return %c0_i32, %c0_i32_0 : i32, i32
  }
  func.func @transform_2(%arg0: i32) -> (i32, i32) {
    %c0_i32 = arith.constant 0 : i32
    %c0_i32_0 = arith.constant 0 : i32
    %c0_i32_1 = arith.constant 0 : i32
    return %c0_i32, %c0_i32_0 : i32, i32
  }
  func.func @transform_3(%arg0: i32) -> (i32, i32) {
    %c0_i32 = arith.constant 0 : i32
    %c0_i32_0 = arith.constant 0 : i32
    %c0_i32_1 = arith.constant 0 : i32
    return %c0_i32, %c0_i32_0 : i32, i32
  }
  func.func @transform_4(%arg0: i32) -> (i32, i32) {
    %c0_i32 = arith.constant 0 : i32
    %c0_i32_0 = arith.constant 0 : i32
    %c0_i32_1 = arith.constant 0 : i32
    return %c0_i32, %c0_i32_0 : i32, i32
  }
  func.func @transform_5(%arg0: i32) -> (i32, i32) {
    %c0_i32 = arith.constant 0 : i32
    %c0_i32_0 = arith.constant 0 : i32
    %c0_i32_1 = arith.constant 0 : i32
    return %c0_i32, %c0_i32_0 : i32, i32
  }
  func.func @transform_6(%arg0: i32) -> (i32, i32) {
    %c0_i32 = arith.constant 0 : i32
    %c0_i32_0 = arith.constant 0 : i32
    %c0_i32_1 = arith.constant 0 : i32
    return %c0_i32, %c0_i32_0 : i32, i32
  }
  func.func @transform_7(%arg0: i32) -> (i32, i32) {
    %c0_i32 = arith.constant 0 : i32
    %c0_i32_0 = arith.constant 0 : i32
    %c0_i32_1 = arith.constant 0 : i32
    return %c0_i32, %c0_i32_0 : i32, i32
  }
  func.func @transform_8(%arg0: i32) -> (i32, i32, i32) {
    %c0_i32 = arith.constant 0 : i32
    %c0_i32_0 = arith.constant 0 : i32
    %c0_i32_1 = arith.constant 0 : i32
    return %arg0, %c0_i32, %c0_i32_0 : i32, i32, i32
  }
}

</mosaic_0001>

<bundles_post_ra>
// kernel: affine_coupling_forward.1
= control target key start
LH: loop header
LB: loop body
LE: loop exit
PB: predicated region body
PF: predicated region fallthrough
CT: control target
= control target key end

     0   :  { %s1620_s27 = smov 0   ;;  %s2101_s0 = inlined_call_operand.vmem [shape: f32[2,4,256], index: 0, kind: input, shape index: {}]   ;;  %s2102_s1 = inlined_call_operand.vmem [shape: f32[9,256], index: 1, kind: input, shape index: {}]   ;;  %s2103_s2 = inlined_call_operand.vmem [shape: bf16[128,18], index: 2, kind: input, shape index: {}]   ;;  %s2104_s3 = inlined_call_operand.vmem [shape: f32[128,1], index: 3, kind: input, shape index: {}]   ;;  %s2105_s4 = inlined_call_operand.vmem [shape: bf16[128,128], index: 4, kind: input, shape index: {}]   ;;  %s2106_s5 = inlined_call_operand.vmem [shape: f32[128,1], index: 5, kind: input, shape index: {}]   ;;  %s2107_s6 = inlined_call_operand.vmem [shape: bf16[36,128], index: 6, kind: input, shape index: {}]   ;;  %s2108_s7 = inlined_call_operand.vmem [shape: f32[4,1], index: 7, kind: input, shape index: {}]   ;;  %s2109_s8 = inlined_call_operand.vmem [shape: f32[2,4,256], index: 8, kind: output, shape index: {}]  }
   0x1 LB: > { %s1468_s28 = sadd.s32 4294967295, %s1564_s27   ;;  %p1472_p0 = scmp.ge.s32.totalorder %s1564_s27, 1  ;;  %s1564_s27 = sphi %s1620_s27, %s18_s27  }
   0x2   : > { %p262_p1 = scmp.lt.s32.totalorder %s1564_s27, 3 }
   0x4   : > { %p263_p2 = pnand %p1472_p0, %p262_p1 }
   0x5   : > { %p296_p3 = scmp.lt.s32.totalorder (!%p263_p2), %s1468_s28, 1  ;;  %s1566_s11 = smov (!%p263_p2), 127   ;;  %v1573_v2 = vmov (!%p263_p2), 0   ;;  %v541_v3 = vld [vmem:[%s2104_s3 + $0x8] sm:$0xff] (!%p263_p2)  ;;  %v540_v4 = vld [vmem:[%s2104_s3] sm:$0xff] (!%p263_p2)  ;;  %v542_v5 = vld [vmem:[%s2104_s3 + $0x10] sm:$0xff] (!%p263_p2)  ;;  %v319_v20 = vlaneseq (!%p263_p2) }
   0x6   : > { %266 = sbr.rel (%p263_p2) target bundleno = 1135 (0x46f), region = 52  ;;  %s1567_s12 = smov (!%p263_p2), 16   ;;  %740 = vmatprep.mubr.bf16.mxu0 (!%p263_p2), %v1573_v2  ;;  %1529 = vset.pattern.permute.xlu1 (!%p263_p2), %v1573_v2  ;;  %v544_v6 = vld [vmem:[%s2104_s3 + $0x20] sm:$0xff] (!%p263_p2)  ;;  %v543_v7 = vld [vmem:[%s2104_s3 + $0x18] sm:$0xff] (!%p263_p2)  ;;  %v546_v8 = vld [vmem:[%s2104_s3 + $0x30] sm:$0xff] (!%p263_p2)  ;;  %vm505_vm5 = vcmask (!%p263_p2), 1041408  }
   0x7   : > { %s1568_s13 = smov (!%p263_p2), 15   ;;  %s1569_s14 = smov (!%p263_p2), 113   ;;  %1528 = vset.pattern.permute.xlu0 (!%p263_p2), %v1573_v2  ;;  %1061 = vmatprep.mubr.bf16.mxu1 (!%p263_p2), %v1573_v2  ;;  %v545_v9 = vld [vmem:[%s2104_s3 + $0x28] sm:$0xff] (!%p263_p2)  ;;  %v548_v10 = vld [vmem:[%s2104_s3 + $0x40] sm:$0xff] (!%p263_p2)  ;;  %v547_v11 = vld [vmem:[%s2104_s3 + $0x38] sm:$0xff] (!%p263_p2)  ;;  %v1725_v23 = vshrl.u32 (!%p263_p2), %v319_v20, 7 }
   0x8   : > { %s1570_s15 = smov (!%p263_p2), 17   ;;  %s1571_s16 = smov (!%p263_p2), 1   ;;  %v550_v12 = vld [vmem:[%s2104_s3 + $0x50] sm:$0xff] (!%p263_p2)  ;;  %v549_v13 = vld [vmem:[%s2104_s3 + $0x48] sm:$0xff] (!%p263_p2)  ;;  %v552_v14 = vld [vmem:[%s2104_s3 + $0x60] sm:$0xff] (!%p263_p2)  ;;  %v1752_v35 = vand.u32 (!%p263_p2), 127, %v319_v20 }
   0x9   : > { %s1572_s17 = smov (!%p263_p2), 112   ;;  %s1574_s18 = smov (!%p263_p2), 111   ;;  %v551_v15 = vld [vmem:[%s2104_s3 + $0x58] sm:$0xff] (!%p263_p2)  ;;  %v554_v16 = vld [vmem:[%s2104_s3 + $0x70] sm:$0xff] (!%p263_p2)  ;;  %v553_v17 = vld [vmem:[%s2104_s3 + $0x68] sm:$0xff] (!%p263_p2)  ;;  %v387_v28 = vsub.s32 (!%p263_p2), 4, %v1725_v23 }
   0xa   : > { %v885_v18 = vld [vmem:[%s2106_s5] sm:$0xff] (!%p263_p2)  ;;  %v555_v19 = vld [vmem:[%s2104_s3 + $0x78] sm:$0xff] (!%p263_p2)  ;;  %v887_v21 = vld [vmem:[%s2106_s5 + $0x10] sm:$0xff] (!%p263_p2)  ;;  %v407_v38 = vsub.s32 (!%p263_p2), 5, %v1725_v23  ;;  %v360_v39 = vsub.s32 (!%p263_p2), 2, %v1725_v23  ;;  %v343_v42 = vsub.s32 (!%p263_p2), 1, %v1725_v23 }
   0xb   : > { %v886_v22 = vld [vmem:[%s2106_s5 + $0x8] sm:$0xff] (!%p263_p2)  ;;  %v889_v24 = vld [vmem:[%s2106_s5 + $0x20] sm:$0xff] (!%p263_p2)  ;;  %v888_v25 = vld [vmem:[%s2106_s5 + $0x18] sm:$0xff] (!%p263_p2)  ;;  %v424_v44 = vsub.s32 (!%p263_p2), 6, %v1725_v23  ;;  %vm402_vm0 = vcmp.lt.s32.totalorder (!%p263_p2), %v1752_v35, 127  ;;  %vm355_vm1 = vcmp.lt.s32.totalorder (!%p263_p2), %v1752_v35, 15 }
   0xc   : > { %v1737_v29 = vld [vmem:[%s2102_s1] sm:$0xff] (!%p263_p2)  ;;  %v1742_v30 = vld [vmem:[%s2102_s1 + $0x8] sm:$0xff] (!%p263_p2)  ;;  %v891_v31 = vld [vmem:[%s2106_s5 + $0x30] sm:$0xff] (!%p263_p2)  ;;  %vm338_vm2 = vcmp.lt.s32.totalorder (!%p263_p2), %v1752_v35, 16  ;;  %vm419_vm3 = vcmp.lt.s32.totalorder (!%p263_p2), %v1752_v35, 113  ;;  %v326_v47 = vsub.s32 (!%p263_p2), 0, %v1725_v23 }
   0xd   : > { %s2111_s28 = smov (!%p296_p3, %s1468_s28), 1  ;;  %v890_v32 = vld [vmem:[%s2106_s5 + $0x28] sm:$0xff]  ;;  %v1755_v36 = vrot.slane %v1737_v29, %v387_v28  ;;  %v1758_v37 = vrot.slane %v1742_v30, %v387_v28  ;;  %v893_v40 = vld [vmem:[%s2106_s5 + $0x40] sm:$0xff]  ;;  %v892_v45 = vld [vmem:[%s2106_s5 + $0x38] sm:$0xff]  ;;  %v377_v48 = vsub.s32 3, %v1725_v23  ;;  %v1779_v49 = vrot.slane %v1737_v29, %v407_v38 }
   0xe   : > { %s1509_s29 = sshll.u32 %s2111_s28, 3  ;;  %v1782_v50 = vrot.slane %v1742_v30, %v407_v38  ;;  %v1785_v51 = vrot.slane %v1737_v29, %v360_v39  ;;  %v1788_v52 = vrot.slane %v1742_v30, %v360_v39  ;;  %v895_v53 = vld [vmem:[%s2106_s5 + $0x50] sm:$0xff]  ;;  %v1794_v54 = vrot.slane %v1737_v29, %v343_v42  ;;  %v894_v60 = vld [vmem:[%s2106_s5 + $0x48] sm:$0xff] }
   0xf   : > { %s300_s10 = scalar_lea.vmem %s2101_s0, %s1509_s29  ;;  %v395_v46 = vcombine.low %v1755_v36, %v1758_v37  ;;  %v1797_v55 = vrot.slane %v1742_v30, %v343_v42  ;;  %v1800_v57 = vrot.slane %v1737_v29, %v424_v44  ;;  %v1803_v58 = vrot.slane %v1742_v30, %v424_v44  ;;  %v899_v28 = vld [vmem:[%s2106_s5 + $0x70] sm:$0xff]  ;;  %s2028_s21 = scalar_lea.vmem %s2109_s8, %s1509_s29 }
  0x10   : > { %v1636_v0 = vld [vmem:[%s300_s10] sm:$0xff]  ;;  %vm321_vm4 = vcmp.lt.s32.totalorder %v1752_v35, 17  ;;  %vm372_vm6 = vcmp.lt.s32.totalorder %v1752_v35, 1  ;;  %vm508_vm7 = vcmask 1043456   ;;  %vm436_vm8 = vcmp.lt.s32.totalorder %v1752_v35, 112 }
  0x11   : > { %398 = vrot.lane.b32.xlu1 %v1636_v0, %s1566_s11  ;;  %334 = vrot.lane.b32.xlu0 %v1636_v0, %s1567_s12  ;;  %v313_v1 = vcombine.high %v1636_v0, %v1636_v0  ;;  %v1814_v63 = vmul.f32 %v395_v46, %v1636_v0  ;;  %vm453_vm9 = vcmp.lt.s32.totalorder %v1752_v35, 111  ;;  %vm511_vm10 = vcmask 1045504   ;;  %1411 = vst [vmem:[%s2028_s21] sm:$0x33] %v1636_v0 }
  0x12   : > { %vm701_vm11 = vcmask 1040384   ;;  %vm676_vm12 = vcmask 146432  }
  0x15   : > { %351 = vrot.lane.b32.xlu0 %v1636_v0, %s1568_s13  ;;  %400 = vrot.lane.b32.xlu1 %v313_v1, %s1566_s11 }
  0x19   : > { %353 = vrot.lane.b32.xlu1 %v313_v1, %s1568_s13  ;;  %336 = vrot.lane.b32.xlu0 %v313_v1, %s1567_s12 }
  0x1d   : > { %417 = vrot.lane.b32.xlu1 %v313_v1, %s1569_s14  ;;  %415 = vrot.lane.b32.xlu0 %v1636_v0, %s1569_s14 }
  0x21   : > { %317 = vrot.lane.b32.xlu1 %v313_v1, %s1570_s15  ;;  %315 = vrot.lane.b32.xlu0 %v1636_v0, %s1570_s15 }
  0x25   : > { %370 = vrot.lane.b32.xlu1 %v313_v1, %s1571_s16  ;;  %368 = vrot.lane.b32.xlu0 %v1636_v0, %s1571_s16 }
  0x29   : > { %434 = vrot.lane.b32.xlu1 %v313_v1, %s1572_s17  ;;  %432 = vrot.lane.b32.xlu0 %v1636_v0, %s1572_s17 }
  0x2d   : > { %451 = vrot.lane.b32.xlu1 %v313_v1, %s1574_s18  ;;  %449 = vrot.lane.b32.xlu0 %v1636_v0, %s1574_s18  ;;  %v1817_v1 = vrot.slane %v1737_v29, %v326_v47 }
  0x31   : > { %563 = vperm.xlu1 %1529, %v541_v3   ;;  %558 = vperm.xlu0 %1528, %v540_v4   ;;  %v1820_v3 = vrot.slane %v1742_v30, %v326_v47  ;;  %v1824_v4 = vrot.slane %v1737_v29, %v377_v48 }
  0x35   : > { %568 = vperm.xlu1 %1529, %v542_v5   ;;  %573 = vperm.xlu0 %1528, %v543_v7   ;;  %v1831_v7 = vrot.slane %v1742_v30, %v377_v48 }
  0x39   : > { %578 = vperm.xlu1 %1529, %v544_v6   ;;  %583 = vperm.xlu0 %1528, %v545_v9   ;;  %v897_v9 = vld [vmem:[%s2106_s5 + $0x60] sm:$0xff] }
  0x3d   : > { %588 = vperm.xlu1 %1529, %v546_v8   ;;  %593 = vperm.xlu0 %1528, %v547_v11   ;;  %v441_v8 = vsub.s32 7, %v1725_v23 }
  0x41   : > { %598 = vperm.xlu1 %1529, %v548_v10   ;;  %603 = vperm.xlu0 %1528, %v549_v13  }
  0x45   : > { %608 = vperm.xlu1 %1529, %v550_v12   ;;  %613 = vperm.xlu0 %1528, %v551_v15  }
  0x49   : > { %618 = vperm.xlu1 %1529, %v552_v14   ;;  %623 = vperm.xlu0 %1528, %v553_v17  }
  0x4d   : > { %628 = vperm.xlu1 %1529, %v554_v16   ;;  %633 = vperm.xlu0 %1528, %v555_v19   ;;  %v896_v16 = vld [vmem:[%s2106_s5 + $0x58] sm:$0xff]  ;;  %v485_v19 = vcombine.high %v1814_v63, %v1814_v63 }
  0x51   : > { %903 = vperm.xlu1 %1529, %v885_v18   ;;  %908 = vperm.xlu0 %1528, %v886_v22  }
  0x55   : > { %913 = vperm.xlu1 %1529, %v887_v21   ;;  %918 = vperm.xlu0 %1528, %v888_v25  }
  0x59   : > { %923 = vperm.xlu1 %1529, %v889_v24   ;;  %928 = vperm.xlu0 %1528, %v890_v32  }
  0x5d   : > { %933 = vperm.xlu1 %1529, %v891_v31   ;;  %938 = vperm.xlu0 %1528, %v892_v45  }
  0x61   : > { %943 = vperm.xlu1 %1529, %v893_v40   ;;  %948 = vperm.xlu0 %1528, %v894_v60  }
  0x65   : > { %953 = vperm.xlu1 %1529, %v895_v53   ;;  %958 = vperm.xlu0 %1528, %v896_v16   ;;  %v1380_v53 = vld [vmem:[%s2108_s7] sm:$0xf]  ;;  %v1911_v16 = vld [vmem:[%s2102_s1 + $0x18] ss:$0 sm:$0xff] }
  0x69   : > { %963 = vperm.xlu1 %1529, %v897_v9  }
  0x6d   : > { %973 = vperm.xlu1 %1529, %v899_v28  }
  0x71   : > { %1383 = vperm.xlu1 %1529, %v1380_v53   ;;  %v1537_v53 = vld [vmem:[%s2103_s2 + $0x30] sm:$0xff]  }
  0x83   : > { %v399_v26 = vpop.permute.xlu1 %398  ;;  %v335_v27 = vpop.permute.xlu0 %334 }
  0x87   : > { %v1750_v33 = vpop.permute.xlu0 %351  ;;  %v401_v34 = vpop.permute.xlu1 %400 }
  0x88   : > { %v403_v61 = vsel %vm402_vm0, %v399_v26, %v401_v34  ;;  %v404_v62 = vsel %vm402_vm0, %v401_v34, %v399_v26  ;;  %v1864_v26 = vrot.slane %v1737_v29, %v441_v8  ;;  %v898_v29 = vld [vmem:[%s2106_s5 + $0x68] sm:$0xff] }
  0x89   : > { %v413_v10 = vmul.f32 %v1779_v49, %v403_v61  ;;  %v414_v11 = vmul.f32 %v1782_v50, %v404_v62  ;;  %968 = vperm.xlu0 %1528, %v898_v29  }
  0x8b   : > { %v354_v41 = vpop.permute.xlu1 %353  ;;  %v337_v43 = vpop.permute.xlu0 %336  ;;  %v489_v31 = vrot.slane %v413_v10, 6  ;;  %v490_v32 = vrot.slane %v414_v11, 6 }
  0x8c   : > { %v339_v5 = vsel %vm338_vm2, %v335_v27, %v337_v43  ;;  %v340_v6 = vsel %vm338_vm2, %v337_v43, %v335_v27  ;;  %v356_v20 = vsel %vm355_vm1, %v1750_v33, %v354_v41  ;;  %v357_v21 = vsel %vm355_vm1, %v354_v41, %v1750_v33 }
  0x8d   : > { %v349_v22 = vmul.f32 %v1794_v54, %v340_v6  ;;  %v350_v23 = vmul.f32 %v1797_v55, %v339_v5  ;;  %v1867_v27 = vrot.slane %v1742_v30, %v441_v8  ;;  %v366_v30 = vmul.f32 %v1785_v51, %v357_v21  ;;  %v900_v6 = vld [vmem:[%s2106_s5 + $0x78] sm:$0xff] }
  0x8e   : > { %v367_v40 = vmul.f32 %v1788_v52, %v356_v20  ;;  %v515_v61 = vsel %vm505_vm5, %v485_v19, %v490_v32  ;;  %v514_v5 = vsel %vm505_vm5, %v1814_v63, %v489_v31  ;;  %v1906_v63 = vld [vmem:[%s2102_s1 + $0x10] ss:$0 sm:$0xff]  ;;  %978 = vperm.xlu0 %1528, %v900_v6  }
  0x8f   : > { %v418_v56 = vpop.permute.xlu1 %417  ;;  %v416_v59 = vpop.permute.xlu0 %415  ;;  %v468_v43 = vrot.slane %v349_v22, 6  ;;  %v469_v44 = vrot.slane %v350_v23, 6 }
  0x90   : > { %v420_v12 = vsel %vm419_vm3, %v416_v59, %v418_v56  ;;  %v421_v13 = vsel %vm419_vm3, %v418_v56, %v416_v59 }
  0x91   : > { %v430_v24 = vmul.f32 %v1800_v57, %v420_v12  ;;  %v431_v25 = vmul.f32 %v1803_v58, %v421_v13  ;;  %v474_v12 = vrot.slane %v366_v30, 4  ;;  %v475_v13 = vrot.slane %v367_v40, 4 }
  0x93   : > { %v318_v14 = vpop.permute.xlu1 %317  ;;  %v316_v15 = vpop.permute.xlu0 %315  ;;  %v495_v47 = vrot.slane %v430_v24, 4  ;;  %v496_v48 = vrot.slane %v431_v25, 4 }
  0x94   : > { %v322_v17 = vsel %vm321_vm4, %v316_v15, %v318_v14  ;;  %v323_v18 = vsel %vm321_vm4, %v318_v14, %v316_v15 }
  0x95   : > { %v332_v33 = vmul.f32 %v1817_v1, %v323_v18  ;;  %v333_v34 = vmul.f32 %v1820_v3, %v322_v17  ;;  %v517_v17 = vsel %vm508_vm7, %v515_v61, %v496_v48  ;;  %v516_v18 = vsel %vm508_vm7, %v514_v5, %v495_v47  ;;  %v1535_v47 = vld [vmem:[%s2103_s2 + $0x20] sm:$0xff]   ;;  %v1536_v48 = vld [vmem:[%s2103_s2 + $0x28] sm:$0xff]  }
  0x97   : > { %v371_v38 = vpop.permute.xlu1 %370  ;;  %v369_v39 = vpop.permute.xlu0 %368  ;;  %v507_v60 = vsel %vm505_vm5, %v333_v34, %v469_v44  ;;  %v506_v62 = vsel %vm505_vm5, %v332_v33, %v468_v43  ;;  %v1531_v43 = vld [vmem:[%s2103_s2] sm:$0xff]   ;;  %v1532_v44 = vld [vmem:[%s2103_s2 + $0x8] sm:$0xff]  }
  0x98   : > { %v373_v41 = vsel %vm372_vm6, %v369_v39, %v371_v38  ;;  %v374_v42 = vsel %vm372_vm6, %v371_v38, %v369_v39  ;;  %v510_v23 = vsel %vm508_vm7, %v507_v60, %v475_v13  ;;  %v509_v24 = vsel %vm508_vm7, %v506_v62, %v474_v12 }
  0x99   : > { %v383_v45 = vmul.f32 %v1824_v4, %v374_v42  ;;  %v384_v46 = vmul.f32 %v1831_v7, %v373_v41 }
  0x9b   : > { %v435_v56 = vpop.permute.xlu1 %434  ;;  %v433_v59 = vpop.permute.xlu0 %432  ;;  %v480_v8 = vrot.slane %v383_v45, 2  ;;  %v481_v9 = vrot.slane %v384_v46, 2  ;;  %v1533_v45 = vld [vmem:[%s2103_s2 + $0x10] sm:$0xff]   ;;  %v1534_v46 = vld [vmem:[%s2103_s2 + $0x18] sm:$0xff]  }
  0x9c   : > { %v437_v10 = vsel %vm436_vm8, %v433_v59, %v435_v56  ;;  %v438_v11 = vsel %vm436_vm8, %v435_v56, %v433_v59  ;;  %v1538_v56 = vld [vmem:[%s2103_s2 + $0x38] sm:$0xff]  }
  0x9d   : > { %v447_v14 = vmul.f32 %v1864_v26, %v437_v10  ;;  %v448_v15 = vmul.f32 %v1867_v27, %v438_v11  ;;  %v513_v31 = vsel %vm511_vm10, %v510_v23, %v481_v9  ;;  %v512_v32 = vsel %vm511_vm10, %v509_v24, %v480_v8 }
  0x9f   : > { %v501_v19 = vrot.slane %v447_v14, 2  ;;  %v502_v20 = vrot.slane %v448_v15, 2  ;;  %v452_v21 = vpop.permute.xlu1 %451  ;;  %v450_v22 = vpop.permute.xlu0 %449 }
  0xa0   : > { %v454_v25 = vsel %vm453_vm9, %v450_v22, %v452_v21  ;;  %v455_v28 = vsel %vm453_vm9, %v452_v21, %v450_v22 }
  0xa1   : > { %v464_v33 = vmul.f32 %v1906_v63, %v454_v25  ;;  %v465_v34 = vmul.f32 %v1911_v16, %v455_v28  ;;  %v519_v38 = vsel %vm511_vm10, %v517_v17, %v502_v20  ;;  %v518_v39 = vsel %vm511_vm10, %v516_v18, %v501_v19 }
  0xa2   : > { %v537_v29 = vpack.c.bf16 %v519_v38, %v513_v31  ;;  %v536_v30 = vpack.c.bf16 %v518_v39, %v512_v32 }
  0xa3   : > { %v538_v40 = vpack.c.bf16 %v464_v33, %v464_v33  ;;  %v539_v41 = vpack.c.bf16 %v465_v34, %v465_v34 }
  0xa4   : > { %708 = vmatprep.subr.bf16.mxu0 %v537_v29 }
  0xa5   : > { %709 = vmatpush1.bf16.msra.mxu0 %v536_v30  ;;  %v703_v42 = vsel %vm701_vm11, %v538_v40, 0 }
  0xa6   : > { %1487 = vmatprep.subr.msk.bf16.mxu0 %vm701_vm11, %v539_v41 }
  0xa9   : > { %711 = vmatpush1.bf16.msra.mxu0 %v703_v42 }
  0xac   : > { %1488 = vmatmul.mubr.msk.bf16.vlgmr.msra.gmra.mrb[0].mxu0 %vm676_vm12, %v1531_v43 }
  0xad   : > { %750 = vmatprep.mubr.bf16.mxu0 %v1573_v2 }
  0xb0   : > { %v559_v59 = vpop.permute.xlu0 %558  ;;  %v564_v5 = vpop.permute.xlu1 %563 }
  0xb4   : > { %1489 = vmatmul.mubr.msk.bf16.gmra.mrb[4].mxu0 %vm676_vm12, %v1532_v44  ;;  %v569_v18 = vpop.permute.xlu1 %568  ;;  %v574_v23 = vpop.permute.xlu0 %573 }
  0xb5   : > { %760 = vmatprep.mubr.bf16.mxu0 %v1573_v2 }
  0xb8   : > { %v579_v30 = vpop.permute.xlu1 %578  ;;  %v584_v44 = vpop.permute.xlu0 %583 }
  0xbc   : > { %1490 = vmatmul.mubr.msk.bf16.gmra.mrb[8].mxu0 %vm676_vm12, %v1533_v45 }
  0xbd   : > { %770 = vmatprep.mubr.bf16.mxu0 %v1573_v2 }
  0xc4   : > { %1491 = vmatmul.mubr.msk.bf16.gmra.mrb[12].mxu0 %vm676_vm12, %v1534_v46 }
  0xc5   : > { %780 = vmatprep.mubr.bf16.mxu0 %v1573_v2 }
  0xcc   : > { %1492 = vmatmul.mubr.msk.bf16.gmra.mrb[16].mxu0 %vm676_vm12, %v1535_v47 }
  0xcd   : > { %790 = vmatprep.mubr.bf16.mxu0 %v1573_v2 }
  0xd4   : > { %1493 = vmatmul.mubr.msk.bf16.gmra.mrb[20].mxu0 %vm676_vm12, %v1536_v48 }
  0xd5   : > { %800 = vmatprep.mubr.bf16.mxu0 %v1573_v2 }
  0xdc   : > { %1494 = vmatmul.mubr.msk.bf16.gmra.mrb[24].mxu0 %vm676_vm12, %v1537_v53 }
  0xdd   : > { %810 = vmatprep.mubr.bf16.mxu0 %v1573_v2 }
  0xe4   : > { %1495 = vmatmul.mubr.msk.bf16.gmra.mrb[28].mxu0 %vm676_vm12, %v1538_v56 }
  0xe5   : > { %1243 = vmatprep.mubr.bf16.mxu0 %v1573_v2 }
 0x17f   : > { %v742_v60 = vpop.f32.mrb[0].mxu0 }
 0x180   : > { %v743_v61 = vadd.f32 %v742_v60, %v559_v59  ;;  %v744_v62 = vpop.f32.mrb[1].mxu0 }
 0x181   : > { %v745_v6 = vadd.f32 %v744_v62, %v559_v59  ;;  %v746_v8 = vpop.f32.mrb[2].mxu0 }
 0x182   : > { %v747_v9 = vadd.f32 %v746_v8, %v564_v5  ;;  %v748_v10 = vpop.f32.mrb[3].mxu0  ;;  %v821_v12 = vmax.f32 %v743_v61, 0.0 }
 0x183   : > { %v749_v11 = vadd.f32 %v748_v10, %v564_v5  ;;  %v822_v14 = vmax.f32 %v745_v6, 0.0  ;;  %v589_v5 = vpop.permute.xlu1 %588 }
 0x184   : > { %v823_v13 = vmax.f32 %v747_v9, 0.0 }
 0x185   : > { %v824_v15 = vmax.f32 %v749_v11, 0.0  ;;  %v594_v11 = vpop.permute.xlu0 %593 }
 0x186   : > { %v869_v17 = vpack.c.bf16 %v823_v13, %v821_v12 }
 0x187   : > { %v752_v19 = vpop.f32.mrb[4].mxu0  ;;  %v870_v20 = vpack.c.bf16 %v824_v15, %v822_v14 }
 0x188   : > { %v753_v21 = vadd.f32 %v752_v19, %v569_v18  ;;  %v754_v22 = vpop.f32.mrb[5].mxu0 }
 0x189   : > { %v755_v24 = vadd.f32 %v754_v22, %v569_v18  ;;  %v756_v25 = vpop.f32.mrb[6].mxu0  ;;  %1029 = vmatprep.subr.bf16.mxu1 %v870_v20 }
 0x18a   : > { %v757_v28 = vadd.f32 %v756_v25, %v574_v23  ;;  %v758_v31 = vpop.f32.mrb[7].mxu0  ;;  %1030 = vmatpush1.bf16.msra.mxu1 %v869_v17  ;;  %v825_v33 = vmax.f32 %v753_v21, 0.0 }
 0x18b   : > { %v759_v32 = vadd.f32 %v758_v31, %v574_v23  ;;  %v826_v38 = vmax.f32 %v755_v24, 0.0  ;;  %v599_v23 = vpop.permute.xlu1 %598 }
 0x18c   : > { %v827_v34 = vmax.f32 %v757_v28, 0.0 }
 0x18d   : > { %v828_v39 = vmax.f32 %v759_v32, 0.0  ;;  %v604_v32 = vpop.permute.xlu0 %603 }
 0x18e   : > { %v871_v29 = vpack.c.bf16 %v827_v34, %v825_v33 }
 0x18f   : > { %v872_v40 = vpack.c.bf16 %v828_v39, %v826_v38  ;;  %v762_v41 = vpop.f32.mrb[8].mxu0 }
 0x190   : > { %v763_v42 = vadd.f32 %v762_v41, %v579_v30  ;;  %v764_v43 = vpop.f32.mrb[9].mxu0 }
 0x191   : > { %v765_v45 = vadd.f32 %v764_v43, %v579_v30  ;;  %v766_v46 = vpop.f32.mrb[10].mxu0  ;;  %1031 = vmatprep.subr.bf16.mxu1 %v872_v40 }
 0x192   : > { %v767_v47 = vadd.f32 %v766_v46, %v584_v44  ;;  %v768_v48 = vpop.f32.mrb[11].mxu0  ;;  %1032 = vmatpush1.bf16.msra.mxu1 %v871_v29  ;;  %v829_v56 = vmax.f32 %v763_v42, 0.0 }
 0x193   : > { %v769_v53 = vadd.f32 %v768_v48, %v584_v44  ;;  %v830_v60 = vmax.f32 %v765_v45, 0.0  ;;  %v609_v44 = vpop.permute.xlu1 %608 }
 0x194   : > { %v831_v59 = vmax.f32 %v767_v47, 0.0 }
 0x195   : > { %v832_v61 = vmax.f32 %v769_v53, 0.0  ;;  %v614_v53 = vpop.permute.xlu0 %613 }
 0x196   : > { %v873_v62 = vpack.c.bf16 %v831_v59, %v829_v56 }
 0x197   : > { %v874_v6 = vpack.c.bf16 %v832_v61, %v830_v60  ;;  %v772_v8 = vpop.f32.mrb[12].mxu0 }
 0x198   : > { %v773_v9 = vadd.f32 %v772_v8, %v589_v5  ;;  %v774_v10 = vpop.f32.mrb[13].mxu0 }
 0x199   : > { %v775_v12 = vadd.f32 %v774_v10, %v589_v5  ;;  %v776_v13 = vpop.f32.mrb[14].mxu0  ;;  %1033 = vmatprep.subr.bf16.mxu1 %v874_v6 }
 0x19a   : > { %v777_v14 = vadd.f32 %v776_v13, %v594_v11  ;;  %v778_v15 = vpop.f32.mrb[15].mxu0  ;;  %1034 = vmatpush1.bf16.msra.mxu1 %v873_v62  ;;  %v833_v18 = vmax.f32 %v773_v9, 0.0 }
 0x19b   : > { %v779_v17 = vadd.f32 %v778_v15, %v594_v11  ;;  %v834_v20 = vmax.f32 %v775_v12, 0.0  ;;  %v619_v11 = vpop.permute.xlu1 %618 }
 0x19c   : > { %v835_v19 = vmax.f32 %v777_v14, 0.0 }
 0x19d   : > { %v836_v21 = vmax.f32 %v779_v17, 0.0  ;;  %v624_v17 = vpop.permute.xlu0 %623 }
 0x19e   : > { %v875_v22 = vpack.c.bf16 %v835_v19, %v833_v18 }
 0x19f   : > { %v876_v24 = vpack.c.bf16 %v836_v21, %v834_v20  ;;  %v782_v25 = vpop.f32.mrb[16].mxu0 }
 0x1a0   : > { %v783_v28 = vadd.f32 %v782_v25, %v599_v23  ;;  %v784_v31 = vpop.f32.mrb[17].mxu0 }
 0x1a1   : > { %v785_v33 = vadd.f32 %v784_v31, %v599_v23  ;;  %v786_v34 = vpop.f32.mrb[18].mxu0  ;;  %1035 = vmatprep.subr.bf16.mxu1 %v876_v24 }
 0x1a2   : > { %v787_v38 = vadd.f32 %v786_v34, %v604_v32  ;;  %v788_v39 = vpop.f32.mrb[19].mxu0  ;;  %1036 = vmatpush1.bf16.msra.mxu1 %v875_v22  ;;  %v837_v30 = vmax.f32 %v783_v28, 0.0 }
 0x1a3   : > { %v789_v29 = vadd.f32 %v788_v39, %v604_v32  ;;  %v838_v41 = vmax.f32 %v785_v33, 0.0  ;;  %v629_v32 = vpop.permute.xlu1 %628 }
 0x1a4   : > { %v839_v40 = vmax.f32 %v787_v38, 0.0 }
 0x1a5   : > { %v840_v42 = vmax.f32 %v789_v29, 0.0  ;;  %v634_v29 = vpop.permute.xlu0 %633 }
 0x1a6   : > { %v877_v43 = vpack.c.bf16 %v839_v40, %v837_v30 }
 0x1a7   : > { %v878_v45 = vpack.c.bf16 %v840_v42, %v838_v41  ;;  %v792_v46 = vpop.f32.mrb[20].mxu0 }
 0x1a8   : > { %v793_v47 = vadd.f32 %v792_v46, %v609_v44  ;;  %v794_v48 = vpop.f32.mrb[21].mxu0 }
 0x1a9   : > { %v795_v56 = vadd.f32 %v794_v48, %v609_v44  ;;  %v796_v59 = vpop.f32.mrb[22].mxu0  ;;  %1037 = vmatprep.subr.bf16.mxu1 %v878_v45 }
 0x1aa   : > { %v797_v60 = vadd.f32 %v796_v59, %v614_v53  ;;  %v798_v61 = vpop.f32.mrb[23].mxu0  ;;  %1038 = vmatpush1.bf16.msra.mxu1 %v877_v43  ;;  %v841_v5 = vmax.f32 %v793_v47, 0.0  ;;  %v1540_v59 = vld [vmem:[%s2105_s4 + $0x8] sm:$0xff]  }
 0x1ab   : > { %v799_v62 = vadd.f32 %v798_v61, %v614_v53  ;;  %v842_v8 = vmax.f32 %v795_v56, 0.0  ;;  %v1539_v56 = vld [vmem:[%s2105_s4] sm:$0xff]   ;;  %v1542_v61 = vld [vmem:[%s2105_s4 + $0x18] sm:$0xff]  }
 0x1ac   : > { %v843_v6 = vmax.f32 %v797_v60, 0.0  ;;  %v1541_v60 = vld [vmem:[%s2105_s4 + $0x10] sm:$0xff]  }
 0x1ad   : > { %v844_v9 = vmax.f32 %v799_v62, 0.0  ;;  %v1543_v62 = vld [vmem:[%s2105_s4 + $0x20] sm:$0xff]  }
 0x1ae   : > { %v879_v10 = vpack.c.bf16 %v843_v6, %v841_v5  ;;  %v1544_v5 = vld [vmem:[%s2105_s4 + $0x28] sm:$0xff]   ;;  %v1545_v6 = vld [vmem:[%s2105_s4 + $0x30] sm:$0xff]  }
 0x1af   : > { %v880_v12 = vpack.c.bf16 %v844_v9, %v842_v8  ;;  %v802_v13 = vpop.f32.mrb[24].mxu0  ;;  %v1546_v8 = vld [vmem:[%s2105_s4 + $0x38] sm:$0xff]   ;;  %v904_v9 = vpop.permute.xlu1 %903 }
 0x1b0   : > { %v803_v14 = vadd.f32 %v802_v13, %v619_v11  ;;  %v804_v15 = vpop.f32.mrb[25].mxu0  ;;  %v909_v13 = vpop.permute.xlu0 %908 }
 0x1b1   : > { %v805_v18 = vadd.f32 %v804_v15, %v619_v11  ;;  %v806_v19 = vpop.f32.mrb[26].mxu0  ;;  %1039 = vmatprep.subr.bf16.mxu1 %v880_v12 }
 0x1b2   : > { %v807_v20 = vadd.f32 %v806_v19, %v624_v17  ;;  %v808_v21 = vpop.f32.mrb[27].mxu0  ;;  %1040 = vmatpush1.bf16.msra.mxu1 %v879_v10  ;;  %v845_v23 = vmax.f32 %v803_v14, 0.0 }
 0x1b3   : > { %v809_v22 = vadd.f32 %v808_v21, %v624_v17  ;;  %v846_v25 = vmax.f32 %v805_v18, 0.0 }
 0x1b4   : > { %v847_v24 = vmax.f32 %v807_v20, 0.0 }
 0x1b5   : > { %v848_v28 = vmax.f32 %v809_v22, 0.0 }
 0x1b6   : > { %v881_v31 = vpack.c.bf16 %v847_v24, %v845_v23 }
 0x1b7   : > { %v882_v33 = vpack.c.bf16 %v848_v28, %v846_v25  ;;  %v812_v34 = vpop.f32.mrb[28].mxu0  ;;  %v914_v25 = vpop.permute.xlu1 %913 }
 0x1b8   : > { %v813_v38 = vadd.f32 %v812_v34, %v629_v32  ;;  %v814_v39 = vpop.f32.mrb[29].mxu0  ;;  %v919_v34 = vpop.permute.xlu0 %918 }
 0x1b9   : > { %v815_v30 = vadd.f32 %v814_v39, %v629_v32  ;;  %v816_v40 = vpop.f32.mrb[30].mxu0  ;;  %1041 = vmatprep.subr.bf16.mxu1 %v882_v33 }
 0x1ba   : > { %v817_v41 = vadd.f32 %v816_v40, %v634_v29  ;;  %v818_v42 = vpop.f32.mrb[31].mxu0  ;;  %1042 = vmatpush1.bf16.msra.mxu1 %v881_v31  ;;  %v849_v44 = vmax.f32 %v813_v38, 0.0 }
 0x1bb   : > { %v819_v43 = vadd.f32 %v818_v42, %v634_v29  ;;  %v850_v46 = vmax.f32 %v815_v30, 0.0 }
 0x1bc   : > { %v851_v45 = vmax.f32 %v817_v41, 0.0 }
 0x1bd   : > { %v852_v47 = vmax.f32 %v819_v43, 0.0 }
 0x1be   : > { %v883_v48 = vpack.c.bf16 %v851_v45, %v849_v44 }
 0x1bf   : > { %v884_v53 = vpack.c.bf16 %v852_v47, %v850_v46  ;;  %v924_v46 = vpop.permute.xlu1 %923 }
 0x1c1   : > { %1043 = vmatprep.subr.bf16.mxu1 %v884_v53 }
 0x1c2   : > { %1044 = vmatpush1.bf16.msra.mxu1 %v883_v48 }
 0x1c5   : > { %1062 = vmatmul.mubr.bf16.vlgmr.msra.gmra.mrb[0].mxu1 %v1539_v56 }
 0x1c6   : > { %1071 = vmatprep.mubr.bf16.mxu1 %v1573_v2 }
 0x1cd   : > { %1072 = vmatmul.mubr.bf16.gmra.mrb[4].mxu1 %v1540_v59  ;;  %v929_v59 = vpop.permute.xlu0 %928 }
 0x1ce   : > { %1081 = vmatprep.mubr.bf16.mxu1 %v1573_v2 }
 0x1d5   : > { %1082 = vmatmul.mubr.bf16.gmra.mrb[8].mxu1 %v1541_v60 }
 0x1d6   : > { %1091 = vmatprep.mubr.bf16.mxu1 %v1573_v2 }
 0x1dd   : > { %1092 = vmatmul.mubr.bf16.gmra.mrb[12].mxu1 %v1542_v61 }
 0x1de   : > { %1101 = vmatprep.mubr.bf16.mxu1 %v1573_v2 }
 0x1e5   : > { %1102 = vmatmul.mubr.bf16.gmra.mrb[16].mxu1 %v1543_v62 }
 0x1e6   : > { %1111 = vmatprep.mubr.bf16.mxu1 %v1573_v2 }
 0x1ed   : > { %1112 = vmatmul.mubr.bf16.gmra.mrb[20].mxu1 %v1544_v5 }
 0x1ee   : > { %1121 = vmatprep.mubr.bf16.mxu1 %v1573_v2 }
 0x1f5   : > { %1122 = vmatmul.mubr.bf16.gmra.mrb[24].mxu1 %v1545_v6 }
 0x1f6   : > { %1131 = vmatprep.mubr.bf16.mxu1 %v1573_v2 }
 0x1fd   : > { %1132 = vmatmul.mubr.bf16.gmra.mrb[28].mxu1 %v1546_v8 }
 0x298   : > { %v1063_v10 = vpop.f32.mrb[0].mxu1 }
 0x299   : > { %v1064_v11 = vadd.f32 %v1063_v10, %v904_v9  ;;  %v1065_v12 = vpop.f32.mrb[1].mxu1 }
 0x29a   : > { %v1066_v14 = vadd.f32 %v1065_v12, %v904_v9  ;;  %v1067_v15 = vpop.f32.mrb[2].mxu1 }
 0x29b   : > { %v1068_v17 = vadd.f32 %v1067_v15, %v909_v13  ;;  %v1069_v18 = vpop.f32.mrb[3].mxu1  ;;  %v1142_v20 = vmax.f32 %v1064_v11, 0.0 }
 0x29c   : > { %v1070_v19 = vadd.f32 %v1069_v18, %v909_v13  ;;  %v1143_v22 = vmax.f32 %v1066_v14, 0.0  ;;  %v934_v13 = vpop.permute.xlu1 %933 }
 0x29d   : > { %v1144_v21 = vmax.f32 %v1068_v17, 0.0 }
 0x29e   : > { %v1145_v23 = vmax.f32 %v1070_v19, 0.0  ;;  %v939_v19 = vpop.permute.xlu0 %938 }
 0x29f   : > { %v1179_v24 = vpack.c.bf16 %v1144_v21, %v1142_v20 }
 0x2a0   : > { %v1180_v28 = vpack.c.bf16 %v1145_v23, %v1143_v22  ;;  %v1073_v31 = vpop.f32.mrb[4].mxu1 }
 0x2a1   : > { %v1074_v32 = vadd.f32 %v1073_v31, %v914_v25  ;;  %v1075_v33 = vpop.f32.mrb[5].mxu1 }
 0x2a2   : > { %v1076_v38 = vadd.f32 %v1075_v33, %v914_v25  ;;  %v1077_v39 = vpop.f32.mrb[6].mxu1  ;;  %1211 = vmatprep.subr.bf16.mxu0 %v1180_v28 }
 0x2a3   : > { %v1078_v29 = vadd.f32 %v1077_v39, %v919_v34  ;;  %v1079_v30 = vpop.f32.mrb[7].mxu1  ;;  %1212 = vmatpush1.bf16.msra.mxu0 %v1179_v24  ;;  %v1146_v41 = vmax.f32 %v1074_v32, 0.0 }
 0x2a4   : > { %v1080_v40 = vadd.f32 %v1079_v30, %v919_v34  ;;  %v1147_v43 = vmax.f32 %v1076_v38, 0.0  ;;  %v944_v34 = vpop.permute.xlu1 %943 }
 0x2a5   : > { %v1148_v42 = vmax.f32 %v1078_v29, 0.0 }
 0x2a6   : > { %v1149_v44 = vmax.f32 %v1080_v40, 0.0  ;;  %v949_v40 = vpop.permute.xlu0 %948 }
 0x2a7   : > { %v1181_v45 = vpack.c.bf16 %v1148_v42, %v1146_v41 }
 0x2a8   : > { %v1182_v47 = vpack.c.bf16 %v1149_v44, %v1147_v43  ;;  %v1083_v48 = vpop.f32.mrb[8].mxu1 }
 0x2a9   : > { %v1084_v53 = vadd.f32 %v1083_v48, %v924_v46  ;;  %v1085_v56 = vpop.f32.mrb[9].mxu1 }
 0x2aa   : > { %v1086_v60 = vadd.f32 %v1085_v56, %v924_v46  ;;  %v1087_v61 = vpop.f32.mrb[10].mxu1  ;;  %1213 = vmatprep.subr.bf16.mxu0 %v1182_v47 }
 0x2ab   : > { %v1088_v62 = vadd.f32 %v1087_v61, %v929_v59  ;;  %v1089_v5 = vpop.f32.mrb[11].mxu1  ;;  %1214 = vmatpush1.bf16.msra.mxu0 %v1181_v45  ;;  %v1150_v8 = vmax.f32 %v1084_v53, 0.0 }
 0x2ac   : > { %v1090_v6 = vadd.f32 %v1089_v5, %v929_v59  ;;  %v1151_v10 = vmax.f32 %v1086_v60, 0.0  ;;  %v954_v59 = vpop.permute.xlu1 %953 }
 0x2ad   : > { %v1152_v9 = vmax.f32 %v1088_v62, 0.0 }
 0x2ae   : > { %v1153_v11 = vmax.f32 %v1090_v6, 0.0  ;;  %v959_v6 = vpop.permute.xlu0 %958 }
 0x2af   : > { %v1183_v12 = vpack.c.bf16 %v1152_v9, %v1150_v8 }
 0x2b0   : > { %v1184_v14 = vpack.c.bf16 %v1153_v11, %v1151_v10  ;;  %v1093_v15 = vpop.f32.mrb[12].mxu1 }
 0x2b1   : > { %v1094_v17 = vadd.f32 %v1093_v15, %v934_v13  ;;  %v1095_v18 = vpop.f32.mrb[13].mxu1 }
 0x2b2   : > { %v1096_v20 = vadd.f32 %v1095_v18, %v934_v13  ;;  %v1097_v21 = vpop.f32.mrb[14].mxu1  ;;  %1215 = vmatprep.subr.bf16.mxu0 %v1184_v14 }
 0x2b3   : > { %v1098_v22 = vadd.f32 %v1097_v21, %v939_v19  ;;  %v1099_v23 = vpop.f32.mrb[15].mxu1  ;;  %1216 = vmatpush1.bf16.msra.mxu0 %v1183_v12  ;;  %v1154_v25 = vmax.f32 %v1094_v17, 0.0 }
 0x2b4   : > { %v1100_v24 = vadd.f32 %v1099_v23, %v939_v19  ;;  %v1155_v31 = vmax.f32 %v1096_v20, 0.0  ;;  %v964_v19 = vpop.permute.xlu1 %963 }
 0x2b5   : > { %v1156_v28 = vmax.f32 %v1098_v22, 0.0 }
 0x2b6   : > { %v1157_v32 = vmax.f32 %v1100_v24, 0.0  ;;  %v969_v24 = vpop.permute.xlu0 %968 }
 0x2b7   : > { %v1185_v33 = vpack.c.bf16 %v1156_v28, %v1154_v25 }
 0x2b8   : > { %v1186_v38 = vpack.c.bf16 %v1157_v32, %v1155_v31  ;;  %v1103_v39 = vpop.f32.mrb[16].mxu1 }
 0x2b9   : > { %v1104_v29 = vadd.f32 %v1103_v39, %v944_v34  ;;  %v1105_v30 = vpop.f32.mrb[17].mxu1 }
 0x2ba   : > { %v1106_v41 = vadd.f32 %v1105_v30, %v944_v34  ;;  %v1107_v42 = vpop.f32.mrb[18].mxu1  ;;  %1217 = vmatprep.subr.bf16.mxu0 %v1186_v38 }
 0x2bb   : > { %v1108_v43 = vadd.f32 %v1107_v42, %v949_v40  ;;  %v1109_v44 = vpop.f32.mrb[19].mxu1  ;;  %1218 = vmatpush1.bf16.msra.mxu0 %v1185_v33  ;;  %v1158_v46 = vmax.f32 %v1104_v29, 0.0 }
 0x2bc   : > { %v1110_v45 = vadd.f32 %v1109_v44, %v949_v40  ;;  %v1159_v48 = vmax.f32 %v1106_v41, 0.0  ;;  %v974_v40 = vpop.permute.xlu1 %973 }
 0x2bd   : > { %v1160_v47 = vmax.f32 %v1108_v43, 0.0 }
 0x2be   : > { %v1161_v53 = vmax.f32 %v1110_v45, 0.0  ;;  %v979_v45 = vpop.permute.xlu0 %978 }
 0x2bf   : > { %v1187_v56 = vpack.c.bf16 %v1160_v47, %v1158_v46 }
 0x2c0   : > { %v1188_v60 = vpack.c.bf16 %v1161_v53, %v1159_v48  ;;  %v1113_v61 = vpop.f32.mrb[20].mxu1 }
 0x2c1   : > { %v1114_v62 = vadd.f32 %v1113_v61, %v954_v59  ;;  %v1115_v5 = vpop.f32.mrb[21].mxu1 }
 0x2c2   : > { %v1116_v8 = vadd.f32 %v1115_v5, %v954_v59  ;;  %v1117_v9 = vpop.f32.mrb[22].mxu1  ;;  %1219 = vmatprep.subr.bf16.mxu0 %v1188_v60 }
 0x2c3   : > { %v1118_v10 = vadd.f32 %v1117_v9, %v959_v6  ;;  %v1119_v11 = vpop.f32.mrb[23].mxu1  ;;  %1220 = vmatpush1.bf16.msra.mxu0 %v1187_v56  ;;  %v1162_v13 = vmax.f32 %v1114_v62, 0.0  ;;  %v1548_v9 = vld [vmem:[%s2107_s6 + $0x8] sm:$0xff]  }
 0x2c4   : > { %v1120_v12 = vadd.f32 %v1119_v11, %v959_v6  ;;  %v1163_v15 = vmax.f32 %v1116_v8, 0.0  ;;  %v1547_v8 = vld [vmem:[%s2107_s6] sm:$0xff]  }
 0x2c5   : > { %v1164_v14 = vmax.f32 %v1118_v10, 0.0  ;;  %v1549_v10 = vld [vmem:[%s2107_s6 + $0x10] ss:$0 sps:$4 sm:$0x33]  }
 0x2c6   : > { %v1165_v17 = vmax.f32 %v1120_v12, 0.0 }
 0x2c7   : > { %v1189_v18 = vpack.c.bf16 %v1164_v14, %v1162_v13 }
 0x2c8   : > { %v1190_v20 = vpack.c.bf16 %v1165_v17, %v1163_v15  ;;  %v1123_v21 = vpop.f32.mrb[24].mxu1 }
 0x2c9   : > { %v1124_v22 = vadd.f32 %v1123_v21, %v964_v19  ;;  %v1125_v23 = vpop.f32.mrb[25].mxu1 }
 0x2ca   : > { %v1126_v25 = vadd.f32 %v1125_v23, %v964_v19  ;;  %v1127_v28 = vpop.f32.mrb[26].mxu1  ;;  %1221 = vmatprep.subr.bf16.mxu0 %v1190_v20 }
 0x2cb   : > { %v1128_v31 = vadd.f32 %v1127_v28, %v969_v24  ;;  %v1129_v32 = vpop.f32.mrb[27].mxu1  ;;  %1222 = vmatpush1.bf16.msra.mxu0 %v1189_v18  ;;  %v1166_v34 = vmax.f32 %v1124_v22, 0.0 }
 0x2cc   : > { %v1130_v33 = vadd.f32 %v1129_v32, %v969_v24  ;;  %v1167_v39 = vmax.f32 %v1126_v25, 0.0 }
 0x2cd   : > { %v1168_v38 = vmax.f32 %v1128_v31, 0.0 }
 0x2ce   : > { %v1169_v29 = vmax.f32 %v1130_v33, 0.0 }
 0x2cf   : > { %v1191_v30 = vpack.c.bf16 %v1168_v38, %v1166_v34  ;;  %v2040_v38 = vpop.permute.xlu1 %1383 }
 0x2d0   : > { %v1192_v41 = vpack.c.bf16 %v1169_v29, %v1167_v39  ;;  %v1133_v42 = vpop.f32.mrb[28].mxu1 }
 0x2d1   : > { %v1134_v43 = vadd.f32 %v1133_v42, %v974_v40  ;;  %v1135_v44 = vpop.f32.mrb[29].mxu1 }
 0x2d2   : > { %v1136_v46 = vadd.f32 %v1135_v44, %v974_v40  ;;  %v1137_v47 = vpop.f32.mrb[30].mxu1  ;;  %1223 = vmatprep.subr.bf16.mxu0 %v1192_v41 }
 0x2d3   : > { %v1138_v48 = vadd.f32 %v1137_v47, %v979_v45  ;;  %v1139_v53 = vpop.f32.mrb[31].mxu1  ;;  %1224 = vmatpush1.bf16.msra.mxu0 %v1191_v30  ;;  %v1170_v59 = vmax.f32 %v1134_v43, 0.0 }
 0x2d4   : > { %v1140_v56 = vadd.f32 %v1139_v53, %v979_v45  ;;  %v1171_v61 = vmax.f32 %v1136_v46, 0.0 }
 0x2d5   : > { %v1172_v60 = vmax.f32 %v1138_v48, 0.0 }
 0x2d6   : > { %v1173_v62 = vmax.f32 %v1140_v56, 0.0 }
 0x2d7   : > { %v1193_v5 = vpack.c.bf16 %v1172_v60, %v1170_v59 }
 0x2d8   : > { %v1194_v6 = vpack.c.bf16 %v1173_v62, %v1171_v61 }
 0x2da   : > { %1225 = vmatprep.subr.bf16.mxu0 %v1194_v6 }
 0x2db   : > { %1226 = vmatpush1.bf16.msra.mxu0 %v1193_v5 }
 0x2de   : > { %1244 = vmatmul.mubr.bf16.vlgmr.msra.gmra.mrb[32].mxu0 %v1547_v8 }
 0x2df   : > { %1253 = vmatprep.mubr.bf16.mxu0 %v1573_v2 }
 0x2e6   : > { %1254 = vmatmul.mubr.bf16.gmra.mrb[36].mxu0 %v1548_v9 }
 0x2e7   : > { %1263 = vmatprep.mubr.bf16.mxu0 %v1573_v2 }
 0x2ee   : > { %1264 = vmatmul.mubr.bf16.gmra.mrb[40].mxu0 %v1549_v10 }
 0x3b1   : > { %v1245_v11 = vpop.f32.mrb[32].mxu0 }
 0x3b2   : > { %1272 = vrot.lane.b32.xlu1 %v1245_v11, %s1570_s15  ;;  %v1247_v12 = vpop.f32.mrb[33].mxu0  ;;  %v1284_v14 = vrot.slane %v1245_v11, 4 }
 0x3b3   : > { %1274 = vrot.lane.b32.xlu0 %v1247_v12, %s1570_s15  ;;  %v1249_v13 = vpop.f32.mrb[34].mxu0  ;;  %v1285_v17 = vrot.slane %v1247_v12, 4 }
 0x3b4   : > { %v1251_v15 = vpop.f32.mrb[35].mxu0  ;;  %v1310_v20 = vrot.slane %v1249_v13, 4 }
 0x3b5   : > { %v1311_v22 = vrot.slane %v1251_v15, 4 }
 0x3b6   : > { %1288 = vrot.lane.b32.xlu1 %v1284_v14, %s1567_s12 }
 0x3b7   : > { %1290 = vrot.lane.b32.xlu0 %v1285_v17, %s1567_s12 }
 0x3b9   : > { %v2013_v2 = vpop.f32.mrb[36].mxu0 }
 0x3ba   : > { %1298 = vrot.lane.b32.xlu1 %v1249_v13, %s1568_s13  ;;  %v2016_v18 = vpop.f32.mrb[37].mxu0  ;;  %v1330_v23 = vrot.slane %v2013_v2, 4 }
 0x3bb   : > { %1300 = vrot.lane.b32.xlu0 %v1251_v15, %s1568_s13  ;;  %v1259_v19 = vpop.f32.mrb[38].mxu0  ;;  %v1331_v24 = vrot.slane %v2016_v18, 4 }
 0x3bc   : > { %v1261_v21 = vpop.f32.mrb[39].mxu0  ;;  %v1356_v33 = vrot.slane %v1259_v19, 4 }
 0x3bd   : > { %v1357_v34 = vrot.slane %v1261_v21, 4 }
 0x3be   : > { %1314 = vrot.lane.b32.xlu1 %v1310_v20, %s1571_s16 }
 0x3bf   : > { %1316 = vrot.lane.b32.xlu0 %v1311_v22, %s1571_s16 }
 0x3c1   : > { %v1265_v25 = vpop.f32.mrb[40].mxu0 }
 0x3c2   : > { %1334 = vrot.lane.b32.xlu1 %v1330_v23, %s1566_s11  ;;  %v1267_v28 = vpop.f32.mrb[41].mxu0 }
 0x3c3   : > { %1336 = vrot.lane.b32.xlu0 %v1331_v24, %s1566_s11  ;;  %v1269_v31 = vpop.f32.mrb[42].mxu0 }
 0x3c4   : > { %v1270_v32 = vpop.f32.mrb[43].mxu0 }
 0x3c6   : > { %1344 = vrot.lane.b32.xlu1 %v1259_v19, %s1569_s14  ;;  %v1324_v19 = vmul.f32 %v2013_v2, %v1755_v36 }
 0x3c7   : > { %1346 = vrot.lane.b32.xlu0 %v1261_v21, %s1569_s14 }
 0x3ca   : > { %1360 = vrot.lane.b32.xlu1 %v1356_v33, %s1572_s17 }
 0x3cb   : > { %1362 = vrot.lane.b32.xlu0 %v1357_v34, %s1572_s17 }
 0x3ce   : > { %1372 = vrot.lane.b32.xlu1 %v1267_v28, %s1574_s18 }
 0x3cf   : > { %1370 = vrot.lane.b32.xlu0 %v1265_v25, %s1574_s18 }
 0x424   : > { %v1273_v39 = vpop.permute.xlu1 %1272 }
 0x425   : > { %v1275_v29 = vpop.permute.xlu0 %1274 }
 0x426   : > { %v1276_v45 = vsel %vm321_vm4, %v1273_v39, %v1275_v29  ;;  %v1277_v46 = vsel %vm321_vm4, %v1275_v29, %v1273_v39 }
 0x427   : > { %v1278_v60 = vmul.f32 %v1277_v46, %v1817_v1  ;;  %v1279_v61 = vmul.f32 %v1276_v45, %v1820_v3 }
 0x428   : > { %v1289_v30 = vpop.permute.xlu1 %1288 }
 0x429   : > { %v1291_v40 = vpop.permute.xlu0 %1290 }
 0x42a   : > { %v1292_v41 = vsel %vm338_vm2, %v1289_v30, %v1291_v40  ;;  %v1293_v42 = vsel %vm338_vm2, %v1291_v40, %v1289_v30 }
 0x42b   : > { %v1294_v53 = vmul.f32 %v1293_v42, %v1794_v54  ;;  %v1295_v56 = vmul.f32 %v1292_v41, %v1797_v55 }
 0x42c   : > { %v1299_v43 = vpop.permute.xlu1 %1298 }
 0x42d   : > { %v1301_v44 = vpop.permute.xlu0 %1300  ;;  %v1296_v10 = vadd.f32 %v1294_v53, %v1278_v60  ;;  %v1297_v54 = vadd.f32 %v1295_v56, %v1279_v61 }
 0x42e   : > { %v1302_v47 = vsel %vm355_vm1, %v1299_v43, %v1301_v44  ;;  %v1303_v48 = vsel %vm355_vm1, %v1301_v44, %v1299_v43 }
 0x42f   : > { %v1304_v62 = vmul.f32 %v1303_v48, %v1785_v51  ;;  %v1305_v5 = vmul.f32 %v1302_v47, %v1788_v52 }
 0x430   : > { %v1315_v59 = vpop.permute.xlu1 %1314 }
 0x431   : > { %v1317_v6 = vpop.permute.xlu0 %1316  ;;  %v1306_v12 = vadd.f32 %v1304_v62, %v1296_v10  ;;  %v1307_v3 = vadd.f32 %v1305_v5, %v1297_v54 }
 0x432   : > { %v1318_v8 = vsel %vm372_vm6, %v1315_v59, %v1317_v6  ;;  %v1319_v9 = vsel %vm372_vm6, %v1317_v6, %v1315_v59 }
 0x433   : > { %v1320_v55 = vmul.f32 %v1319_v9, %v1824_v4  ;;  %v1321_v11 = vmul.f32 %v1318_v8, %v1831_v7  ;;  %v1325_v4 = vmul.f32 %v2016_v18, %v1758_v37 }
 0x434   : > { %v1335_v1 = vpop.permute.xlu1 %1334 }
 0x435   : > { %v1337_v13 = vpop.permute.xlu0 %1336  ;;  %v1322_v51 = vadd.f32 %v1320_v55, %v1306_v12  ;;  %v1323_v14 = vadd.f32 %v1321_v11, %v1307_v3 }
 0x436   : > { %v1338_v52 = vsel %vm402_vm0, %v1335_v1, %v1337_v13  ;;  %v1339_v15 = vsel %vm402_vm0, %v1337_v13, %v1335_v1 }
 0x437   : > { %v1326_v22 = vadd.f32 %v1324_v19, %v1322_v51  ;;  %v1327_v23 = vadd.f32 %v1325_v4, %v1323_v14  ;;  %v1340_v24 = vmul.f32 %v1338_v52, %v1779_v49  ;;  %v1341_v25 = vmul.f32 %v1339_v15, %v1782_v50 }
 0x438   : > { %v1345_v17 = vpop.permute.xlu1 %1344 }
 0x439   : > { %v1347_v7 = vpop.permute.xlu0 %1346  ;;  %v1342_v32 = vadd.f32 %v1340_v24, %v1326_v22  ;;  %v1343_v33 = vadd.f32 %v1341_v25, %v1327_v23 }
 0x43a   : > { %v1348_v20 = vsel %vm419_vm3, %v1345_v17, %v1347_v7  ;;  %v1349_v21 = vsel %vm419_vm3, %v1347_v7, %v1345_v17 }
 0x43b   : > { %v1350_v31 = vmul.f32 %v1348_v20, %v1800_v57  ;;  %v1351_v36 = vmul.f32 %v1349_v21, %v1803_v58 }
 0x43c   : > { %v1361_v28 = vpop.permute.xlu1 %1360 }
 0x43d   : > { %v1363_v2 = vpop.permute.xlu0 %1362  ;;  %v1352_v50 = vadd.f32 %v1350_v31, %v1342_v32  ;;  %v1353_v29 = vadd.f32 %v1351_v36, %v1343_v33 }
 0x43e   : > { %v1364_v37 = vsel %vm436_vm8, %v1361_v28, %v1363_v2  ;;  %v1365_v18 = vsel %vm436_vm8, %v1363_v2, %v1361_v28 }
 0x43f   : > { %v1366_v34 = vmul.f32 %v1364_v37, %v1864_v26  ;;  %v1367_v49 = vmul.f32 %v1365_v18, %v1867_v27 }
 0x440   : > { %v1373_v39 = vpop.permute.xlu1 %1372 }
 0x441   : > { %v1371_v30 = vpop.permute.xlu0 %1370  ;;  %v1368_v40 = vadd.f32 %v1366_v34, %v1352_v50  ;;  %v1369_v41 = vadd.f32 %v1367_v49, %v1353_v29 }
 0x442   : > { %v1374_v57 = vsel %vm453_vm9, %v1371_v30, %v1373_v39  ;;  %v1375_v58 = vsel %vm453_vm9, %v1373_v39, %v1371_v30 }
 0x443   : > { %v1376_v42 = vmul.f32 %v1906_v63, %v1374_v57  ;;  %v1377_v43 = vmul.f32 %v1911_v16, %v1375_v58 }
 0x445   : > { %v1378_v44 = vadd.f32 %v1376_v42, %v1368_v40  ;;  %v1379_v26 = vadd.f32 %v1377_v43, %v1369_v41 }
 0x447   : > { %v1386_v27 = vadd.f32 %v2040_v38, %v1378_v44  ;;  %v1387_v45 = vadd.f32 %v2040_v38, %v1379_v26 }
 0x449   : > { %v1388_v46 = vadd.f32 2.0, %v1386_v27  ;;  %v1389_v47 = vadd.f32 2.0, %v1387_v45  ;;  %v1402_v48 = vcombine.low %v1386_v27, %v1387_v45 }
 0x44b   : > { %v1390_v53 = vsub.f32 0.0, %v1388_v46  ;;  %v1391_v56 = vsub.f32 0.0, %v1389_v47  ;;  %v1404_v38 = vadd.f32 %v1402_v48, %v1636_v0 }
 0x44d   : > { %v1392_v59 = vmul.f32 1.442695, %v1390_v53  ;;  %v1394_v35 = vmul.f32 1.442695, %v1391_v56 }
 0x44f   : > { %1550 = vpow2.f32 %v1392_v59 }
 0x450   : > { %1552 = vpow2.f32 %v1394_v35 }
 0x459   : > { %v1551_v60 = vpop.eup %1550 }
 0x45a   : > { %v1553_v63 = vpop.eup %1552  ;;  %v1396_v61 = vadd.f32 1.0, %v1551_v60 }
 0x45b   : > { %v1397_v16 = vadd.f32 1.0, %v1553_v63 }
 0x45c   : > { %1554 = vrcp.f32 %v1396_v61 }
 0x45d   : > { %1556 = vrcp.f32 %v1397_v16 }
 0x466   : > { %v1555_v62 = vpop.eup %1554 }
 0x467   : > { %v1557_v5 = vpop.eup %1556 }
 0x468   : > { %v1407_v6 = vcombine.low %v1555_v62, %v1557_v5 }
 0x46a   : > { %v1408_v8 = vrot.slane %v1407_v6, 6 }
 0x46c   : > { %v1410_v9 = vmul.f32 %v1408_v8, %v1404_v38 }
 0x46e   : > { %1412 = vst [vmem:[%s2028_s21] sm:$0xcc] %v1410_v9 }
 0x46f PF: > { %s18_s27 = sadd.s32 1, %s1564_s27  }
 0x470   : > { %p15_p4 = scmp.ge.s32.totalorder %s18_s27, 4  }
 0x472   :  { %17 = sbr.rel (!%p15_p4) target bundleno = 1 (0x1), region = 82 }

</bundles_post_ra>
